<compile_context>
chip_gen: v6e
topology: v6e:2x2x1
jax: 0.10.0
libtpu: 0.0.40
codegen_flags: <defaults>
</compile_context>

<pallas_src>
import math
from functools import partial

import numpy as np
import jax
import jax.numpy as jnp
from jax import lax
from jax.experimental import pallas as pl
from jax.experimental.pallas import tpu as pltpu

_NEG = -1e9            # finite "minus infinity" for masked logits (avoids NaN rows)
_LN_EPS = 1e-5         # PyTorch LayerNorm default
_F32 = jnp.float32
_BF16 = jnp.bfloat16
_VMEM_LIMIT = 48 * 1024 * 1024


def _layernorm(x, g, b):
    mu = jnp.mean(x, axis=-1, keepdims=True)
    var = jnp.mean((x - mu) ** 2, axis=-1, keepdims=True)
    return (x - mu) * lax.rsqrt(var + _LN_EPS) * g + b


def _attention_heads(q, k, v, bias, h, d_k, d_v, scale):
    """Per-head scaled-dot-product attention.

    q: (Sq, h*d_k) f32, k: (Sk, h*d_k) f32, v: (Sk, h*d_v) f32,
    bias: additive (Sq, Sk) f32 mask (0 / -1e9), computed ONCE by the caller.
    Returns concatenated head outputs (Sq, h*d_v) f32.
    """
    heads = []
    for i in range(h):                                      # static unroll over heads
        qh = q[:, i * d_k:(i + 1) * d_k].astype(_BF16)
        kh = k[:, i * d_k:(i + 1) * d_k].astype(_BF16)
        vh = v[:, i * d_v:(i + 1) * d_v].astype(_BF16)
        s = lax.dot_general(qh, kh, (((1,), (1,)), ((), ())),
                            preferred_element_type=_F32)    # (Sq, Sk)
        s = s * scale + bias
        m = jnp.max(s, axis=-1, keepdims=True)
        p = jnp.exp(s - m)
        p = p * pl.reciprocal(jnp.sum(p, axis=-1, keepdims=True), approx=True)
        heads.append(jnp.dot(p.astype(_BF16), vh, preferred_element_type=_F32))
    return jnp.concatenate(heads, axis=-1)                  # (Sq, h*d_v)


# --------------------- self-attention sublayer (fused QKV) ---------------------
# out = LN_layer(x + LN_att(x + W_o @ MHA(x, x, x, causal+pad mask))) * pad

def _self_mha_kernel(x_ref, valid_ref, pad_ref,
                     wqkv_ref, bqkv_ref, wo_ref, bo_ref,
                     lna_g_ref, lna_b_ref, lnl_g_ref, lnl_b_ref,
                     o_ref, *, h, d_k, d_v, scale):
    S = x_ref.shape[1]
    hdk, hdv = h * d_k, h * d_v

    x_b = x_ref[0]                                          # (S, D) bf16
    x = x_b.astype(_F32)

    # single fused QKV projection (one MXU pass instead of three)
    qkv = jnp.dot(x_b, wqkv_ref[...], preferred_element_type=_F32) + bqkv_ref[...]
    q = qkv[:, :hdk]
    k = qkv[:, hdk:2 * hdk]
    v = qkv[:, 2 * hdk:2 * hdk + hdv]

    # causal + key-padding mask built in-kernel, hoisted out of the head loop
    valid = valid_ref[0]                                    # (1, S) int32, 1 = real token
    row = lax.broadcasted_iota(jnp.int32, (S, S), 0)
    col = lax.broadcasted_iota(jnp.int32, (S, S), 1)
    masked = (col > row) | (valid == 0)
    bias = jnp.where(masked, _NEG, 0.0).astype(_F32)        # (S, S)

    att = _attention_heads(q, k, v, bias, h, d_k, d_v, scale)
    proj = jnp.dot(att.astype(_BF16), wo_ref[...],
                   preferred_element_type=_F32) + bo_ref[...]

    mha = _layernorm(x + proj, lna_g_ref[...], lna_b_ref[...])
    out = _layernorm(x + mha, lnl_g_ref[...], lnl_b_ref[...]) * pad_ref[0]
    o_ref[0] = out.astype(o_ref.dtype)


def self_mha_sublayer(x, key_valid, pad_col, p, lnl_g, lnl_b, h, d_k, d_v):
    B, S, D = x.shape
    kern = partial(_self_mha_kernel, h=h, d_k=d_k, d_v=d_v,
                   scale=1.0 / math.sqrt(d_k))
    rep = lambda b: (0, 0)
    return pl.pallas_call(
        kern,
        grid=(B,),
        out_shape=jax.ShapeDtypeStruct((B, S, D), _BF16),
        in_specs=[pl.BlockSpec((1, S, D), lambda b: (b, 0, 0)),
                  pl.BlockSpec((1, 1, S), lambda b: (b, 0, 0)),
                  pl.BlockSpec((1, S, 1), lambda b: (b, 0, 0)),
                  pl.BlockSpec(p['wqkv'].shape, rep),
                  pl.BlockSpec(p['bqkv'].shape, rep),
                  pl.BlockSpec(p['wo'].shape, rep),
                  pl.BlockSpec(p['bo'].shape, rep),
                  pl.BlockSpec(p['ln_g'].shape, rep),
                  pl.BlockSpec(p['ln_b'].shape, rep),
                  pl.BlockSpec(lnl_g.shape, rep),
                  pl.BlockSpec(lnl_b.shape, rep)],
        out_specs=pl.BlockSpec((1, S, D), lambda b: (b, 0, 0)),
        compiler_params=pltpu.CompilerParams(
            dimension_semantics=("parallel",),
            vmem_limit_bytes=_VMEM_LIMIT),
    )(x, key_valid, pad_col, p['wqkv'], p['bqkv'], p['wo'], p['bo'],
      p['ln_g'], p['ln_b'], lnl_g, lnl_b)


# ------------------- cross-attention sublayer (fused KV) -------------------

def _cross_mha_kernel(xq_ref, xkv_ref, enc_valid_ref, pad_ref,
                      wq_ref, bq_ref, wkv_ref, bkv_ref, wo_ref, bo_ref,
                      lna_g_ref, lna_b_ref, lnl_g_ref, lnl_b_ref,
                      o_ref, *, h, d_k, d_v, scale):
    tq = xq_ref.shape[1]
    Sk = xkv_ref.shape[1]
    hdk = h * d_k

    xq_b = xq_ref[0]                                        # (tq, D) bf16
    xq = xq_b.astype(_F32)
    xkv_b = xkv_ref[0]                                      # (Sk, D) bf16

    q = jnp.dot(xq_b, wq_ref[...], preferred_element_type=_F32) + bq_ref[...]
    kv = jnp.dot(xkv_b, wkv_ref[...], preferred_element_type=_F32) + bkv_ref[...]
    k = kv[:, :hdk]
    v = kv[:, hdk:]

    enc_valid = enc_valid_ref[0]                            # (1, Sk) int32
    bias = jnp.broadcast_to(                                # hoisted, done once
        jnp.where(enc_valid == 0, _NEG, 0.0).astype(_F32), (tq, Sk))

    att = _attention_heads(q, k, v, bias, h, d_k, d_v, scale)
    proj = jnp.dot(att.astype(_BF16), wo_ref[...],
                   preferred_element_type=_F32) + bo_ref[...]

    mha = _layernorm(xq + proj, lna_g_ref[...], lna_b_ref[...])
    out = _layernorm(xq + mha, lnl_g_ref[...], lnl_b_ref[...]) * pad_ref[0]
    o_ref[0] = out.astype(o_ref.dtype)


def cross_mha_sublayer(xq, xkv, enc_valid, pad_col, p, lnl_g, lnl_b, h, d_k, d_v):
    B, Sq, D = xq.shape
    Sk = xkv.shape[1]
    tq = _seq_tile(Sq)
    kern = partial(_cross_mha_kernel, h=h, d_k=d_k, d_v=d_v,
                   scale=1.0 / math.sqrt(d_k))
    rep = lambda b, s: (0, 0)
    return pl.pallas_call(
        kern,
        grid=(B, Sq // tq),
        out_shape=jax.ShapeDtypeStruct((B, Sq, D), _BF16),
        in_specs=[pl.BlockSpec((1, tq, D), lambda b, s: (b, s, 0)),
                  pl.BlockSpec((1, Sk, D), lambda b, s: (b, 0, 0)),
                  pl.BlockSpec((1, 1, Sk), lambda b, s: (b, 0, 0)),
                  pl.BlockSpec((1, tq, 1), lambda b, s: (b, s, 0)),
                  pl.BlockSpec(p['wq'].shape, rep),
                  pl.BlockSpec(p['bq'].shape, rep),
                  pl.BlockSpec(p['wkv'].shape, rep),
                  pl.BlockSpec(p['bkv'].shape, rep),
                  pl.BlockSpec(p['wo'].shape, rep),
                  pl.BlockSpec(p['bo'].shape, rep),
                  pl.BlockSpec(p['ln_g'].shape, rep),
                  pl.BlockSpec(p['ln_b'].shape, rep),
                  pl.BlockSpec(lnl_g.shape, rep),
                  pl.BlockSpec(lnl_b.shape, rep)],
        out_specs=pl.BlockSpec((1, tq, D), lambda b, s: (b, s, 0)),
        compiler_params=pltpu.CompilerParams(
            dimension_semantics=("parallel", "parallel"),
            vmem_limit_bytes=_VMEM_LIMIT),
    )(xq, xkv, enc_valid, pad_col, p['wq'], p['bq'], p['wkv'], p['bkv'],
      p['wo'], p['bo'], p['ln_g'], p['ln_b'], lnl_g, lnl_b)


# --------------------------- FFN sublayer ---------------------------
# out = LN_ff(x + fc2(relu(fc1(x)))) * pad

def _ffn_kernel(x_ref, pad_ref, w1_ref, b1_ref, w2_ref, b2_ref,
                g_ref, beta_ref, o_ref):
    x_b = x_ref[0]                                          # (ts, D) bf16
    x = x_b.astype(_F32)
    h1 = jnp.dot(x_b, w1_ref[...], preferred_element_type=_F32) + b1_ref[...]
    h1 = jnp.maximum(h1, 0.0)
    h2 = jnp.dot(h1.astype(_BF16), w2_ref[...], preferred_element_type=_F32) + b2_ref[...]
    out = _layernorm(x + h2, g_ref[...], beta_ref[...]) * pad_ref[0]
    o_ref[0] = out.astype(o_ref.dtype)


def ffn_sublayer(x, pad_col, w1, b1, w2, b2, g, beta):
    B, S, D = x.shape
    ts = _seq_tile(S)
    rep = lambda b, s: (0, 0)
    return pl.pallas_call(
        _ffn_kernel,
        grid=(B, S // ts),
        out_shape=jax.ShapeDtypeStruct((B, S, D), _BF16),
        in_specs=[pl.BlockSpec((1, ts, D), lambda b, s: (b, s, 0)),
                  pl.BlockSpec((1, ts, 1), lambda b, s: (b, s, 0)),
                  pl.BlockSpec(w1.shape, rep),
                  pl.BlockSpec(b1.shape, rep),
                  pl.BlockSpec(w2.shape, rep),
                  pl.BlockSpec(b2.shape, rep),
                  pl.BlockSpec(g.shape, rep),
                  pl.BlockSpec(beta.shape, rep)],
        out_specs=pl.BlockSpec((1, ts, D), lambda b, s: (b, s, 0)),
        compiler_params=pltpu.CompilerParams(
            dimension_semantics=("parallel", "parallel"),
            vmem_limit_bytes=_VMEM_LIMIT),
    )(x, pad_col, w1, b1, w2, b2, g, beta)


# --------------- fused vocab projection + log_softmax ---------------

def _fc_logsoftmax_kernel(x_ref, w_ref, o_ref):
    logits = jnp.dot(x_ref[0], w_ref[...], preferred_element_type=_F32)  # (ts, V)
    m = jnp.max(logits, axis=-1, keepdims=True)
    z = logits - m
    lse = jnp.log(jnp.sum(jnp.exp(z), axis=-1, keepdims=True))
    o_ref[0] = z - lse


def fc_logsoftmax(x, w):
    B, S, D = x.shape
    V = w.shape[1]
    ts = _seq_tile(S)
    return pl.pallas_call(
        _fc_logsoftmax_kernel,
        grid=(B, S // ts),
        out_shape=jax.ShapeDtypeStruct((B, S, V), _F32),
        in_specs=[pl.BlockSpec((1, ts, D), lambda b, s: (b, s, 0)),
                  pl.BlockSpec((D, V), lambda b, s: (0, 0))],
        out_specs=pl.BlockSpec((1, ts, V), lambda b, s: (b, s, 0)),
        compiler_params=pltpu.CompilerParams(
            dimension_semantics=("parallel", "parallel"),
            vmem_limit_bytes=_VMEM_LIMIT),
    )(x, w)


# ----------------------------- helpers / glue -----------------------------

def _seq_tile(s, target=256):
    """Largest legal sequence tile: the full length, or a multiple of 128 dividing it
    (keeps the (8,128) BlockSpec rule satisfied for all partial blocks)."""
    if s <= target:
        return s
    t = (target // 128) * 128
    while t >= 128:
        if s % t == 0:
            return t
        t -= 128
    return s


def sinusoid_encoding_table(n_position, d_hid, padding_idx=None):
    pos = np.arange(n_position)[:, None].astype(np.float64)
    hid = np.arange(d_hid)[None, :]
    angle = pos / np.power(10000.0, 2 * (hid // 2) / d_hid)
    table = np.zeros((n_position, d_hid), dtype=np.float32)
    table[:, 0::2] = np.sin(angle[:, 0::2])
    table[:, 1::2] = np.cos(angle[:, 1::2])
    if padding_idx is not None:
        table[padding_idx] = 0.0
    return jnp.asarray(table)


def transformer_decoder_forward(params, tokens, enc_output, mask_encoder, cfg):
    B, S = tokens.shape
    h, d_k, d_v = cfg['h'], cfg['d_k'], cfg['d_v']
    pad_idx = cfg['padding_idx']
    S_enc = enc_output.shape[1]

    tok_valid = (tokens != pad_idx)
    dec_valid_row = tok_valid.astype(jnp.int32).reshape(B, 1, S)     # key-pad mask (1 = real)
    pad_col = tok_valid.astype(jnp.float32).reshape(B, S, 1)         # query pad multiplier
    enc_valid_row = jnp.logical_not(
        mask_encoder.reshape(B, 1, S_enc)).astype(jnp.int32)         # 1 = real enc position

    seq = jnp.arange(1, S + 1, dtype=jnp.int32)[None, :] * tok_valid.astype(jnp.int32)
    out = (params['word_emb'][tokens] + params['pos_emb'][seq]).astype(_BF16)
    enc_b = enc_output.astype(_BF16)

    for lp in params['layers']:
        out = self_mha_sublayer(out, dec_valid_row, pad_col, lp['self_att'],
                                lp['ln1_g'], lp['ln1_b'], h, d_k, d_v)
        out = cross_mha_sublayer(out, enc_b, enc_valid_row, pad_col, lp['enc_att'],
                                 lp['ln2_g'], lp['ln2_b'], h, d_k, d_v)
        out = ffn_sublayer(out, pad_col, lp['w1'], lp['b1'], lp['w2'], lp['b2'],
                           lp['ff_ln_g'], lp['ff_ln_b'])

    return fc_logsoftmax(out, params['fc_w'])                        # (B, S, V) log-probs


# ----------------------------- parameter init -----------------------------

def init_params(key, cfg):
    D, h, dk, dv, dff = cfg['d_model'], cfg['h'], cfg['d_k'], cfg['d_v'], cfg['d_ff']
    V, max_len, N, pad = cfg['vocab_size'], cfg['max_len'], cfg['N_dec'], cfg['padding_idx']

    def lin(k, fi, fo):
        w = (jax.random.normal(k, (fi, fo), _F32) * 0.02).astype(_BF16)
        return w, jnp.zeros((1, fo), _F32)

    keys = jax.random.split(key, 2 + N)
    we = jax.random.normal(keys[0], (V, D), _F32) * 0.02
    we = we.at[pad].set(0.0)
    pe = sinusoid_encoding_table(max_len + 1, D, padding_idx=0)
    fc_w = (jax.random.normal(keys[1], (D, V), _F32) * 0.02).astype(_BF16)

    layers = []
    for i in range(N):
        lk = jax.random.split(keys[2 + i], 10)

        def self_att_params(ks):
            wq, bq = lin(ks[0], D, h * dk)
            wk, bk = lin(ks[1], D, h * dk)
            wv, bv = lin(ks[2], D, h * dv)
            wo, bo = lin(ks[3], h * dv, D)
            return dict(wqkv=jnp.concatenate([wq, wk, wv], axis=1),   # fused QKV
                        bqkv=jnp.concatenate([bq, bk, bv], axis=1),
                        wo=wo, bo=bo,
                        ln_g=jnp.ones((1, D), _F32), ln_b=jnp.zeros((1, D), _F32))

        def cross_att_params(ks):
            wq, bq = lin(ks[0], D, h * dk)
            wk, bk = lin(ks[1], D, h * dk)
            wv, bv = lin(ks[2], D, h * dv)
            wo, bo = lin(ks[3], h * dv, D)
            return dict(wq=wq, bq=bq,
                        wkv=jnp.concatenate([wk, wv], axis=1),        # fused K/V
                        bkv=jnp.concatenate([bk, bv], axis=1),
                        wo=wo, bo=bo,
                        ln_g=jnp.ones((1, D), _F32), ln_b=jnp.zeros((1, D), _F32))

        w1, b1 = lin(lk[8], D, dff)
        w2, b2 = lin(lk[9], dff, D)
        layers.append(dict(
            self_att=self_att_params(lk[0:4]),
            enc_att=cross_att_params(lk[4:8]),
            ln1_g=jnp.ones((1, D), _F32), ln1_b=jnp.zeros((1, D), _F32),
            ln2_g=jnp.ones((1, D), _F32), ln2_b=jnp.zeros((1, D), _F32),
            w1=w1, b1=b1, w2=w2, b2=b2,
            ff_ln_g=jnp.ones((1, D), _F32), ff_ln_b=jnp.zeros((1, D), _F32)))
    return dict(word_emb=we, pos_emb=pe, fc_w=fc_w, layers=layers)


# ----------------------------- main -----------------------------

if __name__ == "__main__":
    # small but lane-dense config (D, h*d_k, d_ff, V are multiples of 128)
    cfg = dict(vocab_size=128, max_len=20, N_dec=2, padding_idx=0,
               d_model=128, d_k=32, d_v=32, h=4, d_ff=256)
    B, S, S_enc = 2, 8, 16

    key = jax.random.PRNGKey(0)
    k_tok, k_enc, k_params = jax.random.split(key, 3)

    tokens = jax.random.randint(k_tok, (B, S), 1, cfg['vocab_size'], dtype=jnp.int32)
    tokens = tokens.at[1, 6:].set(cfg['padding_idx'])          # trailing padding in 2nd sequence

    enc_output = jax.random.normal(k_enc, (B, S_enc, cfg['d_model']), jnp.float32)
    mask_encoder = jnp.zeros((B, 1, 1, S_enc), dtype=bool)
    mask_encoder = mask_encoder.at[1, 0, 0, 12:].set(True)     # mask last enc positions of 2nd sample

    params = init_params(k_params, cfg)

    fwd = jax.jit(partial(transformer_decoder_forward, cfg=cfg))
    out = fwd(params, tokens, enc_output, mask_encoder)
    jax.block_until_ready(out)

    assert out.shape == (B, S, cfg['vocab_size'])
    assert bool(jnp.all(jnp.isfinite(out)))
    print("KERNEL_OK")
</pallas_src>

<mosaic_0001>
module attributes {stable_mosaic.version = 11 : i64} {
  func.func @_ffn_kernel(%arg0: i32, %arg1: i32, %arg2: memref<1x8x128xbf16, #tpu.memory_space<vmem>>, %arg3: memref<1x8x1xf32, #tpu.memory_space<vmem>>, %arg4: memref<128x256xbf16, #tpu.memory_space<vmem>>, %arg5: memref<1x256xf32, #tpu.memory_space<vmem>>, %arg6: memref<256x128xbf16, #tpu.memory_space<vmem>>, %arg7: memref<1x128xf32, #tpu.memory_space<vmem>>, %arg8: memref<1x128xf32, #tpu.memory_space<vmem>>, %arg9: memref<1x128xf32, #tpu.memory_space<vmem>>, %arg10: memref<1x8x128xbf16, #tpu.memory_space<vmem>>) attributes {dimension_semantics = [#tpu.dimension_semantics<parallel>, #tpu.dimension_semantics<parallel>], iteration_bounds = array<i64: 2, 1>, scalar_prefetch = 0 : i64, scratch_operands = 0 : i64, tpu.core_type = #tpu.core_type<tc>, window_params = [{transform_indices = @transform_0, window_bounds = array<i64: 1, 8, 128>}, {transform_indices = @transform_1, window_bounds = array<i64: 1, 8, 1>}, {pipeline_mode = #tpu.pipeline_mode<synchronous>, transform_indices = @transform_2, window_bounds = array<i64: 128, 256>}, {pipeline_mode = #tpu.pipeline_mode<synchronous>, transform_indices = @transform_3, window_bounds = array<i64: 1, 256>}, {pipeline_mode = #tpu.pipeline_mode<synchronous>, transform_indices = @transform_4, window_bounds = array<i64: 256, 128>}, {pipeline_mode = #tpu.pipeline_mode<synchronous>, transform_indices = @transform_5, window_bounds = array<i64: 1, 128>}, {pipeline_mode = #tpu.pipeline_mode<synchronous>, transform_indices = @transform_6, window_bounds = array<i64: 1, 128>}, {pipeline_mode = #tpu.pipeline_mode<synchronous>, transform_indices = @transform_7, window_bounds = array<i64: 1, 128>}, {transform_indices = @transform_8, window_bounds = array<i64: 1, 8, 128>}]} {
    %c0 = arith.constant 0 : index
    %c0_0 = arith.constant 0 : index
    %c0_1 = arith.constant 0 : index
    %0 = vector.load %arg2[%c0, %c0_0, %c0_1] : memref<1x8x128xbf16, #tpu.memory_space<vmem>>, vector<1x8x128xbf16>
    %1 = vector.shape_cast %0 : vector<1x8x128xbf16> to vector<8x128xbf16>
    %2 = arith.extf %1 : vector<8x128xbf16> to vector<8x128xf32>
    %c0_2 = arith.constant 0 : index
    %c0_3 = arith.constant 0 : index
    %3 = vector.load %arg4[%c0_2, %c0_3] : memref<128x256xbf16, #tpu.memory_space<vmem>>, vector<128x256xbf16>
    %cst = arith.constant dense<0.000000e+00> : vector<8x256xf32>
    %4 = tpu.matmul %1, %3, %cst {dimension_numbers = #tpu.dot_dimension_numbers<[1], [0], [0], [1], [0, 0, 1, 1], [], []>} : vector<8x128xbf16>, vector<128x256xbf16>, vector<8x256xf32> -> vector<8x256xf32>
    %c0_4 = arith.constant 0 : index
    %c0_5 = arith.constant 0 : index
    %5 = vector.load %arg5[%c0_4, %c0_5] : memref<1x256xf32, #tpu.memory_space<vmem>>, vector<1x256xf32>
    %6 = vector.broadcast %5 : vector<1x256xf32> to vector<8x256xf32>
    %7 = arith.addf %4, %6 : vector<8x256xf32>
    %cst_6 = arith.constant 0.000000e+00 : f32
    %8 = vector.broadcast %cst_6 : f32 to vector<8x256xf32>
    %9 = arith.maximumf %7, %8 : vector<8x256xf32>
    %10 = arith.truncf %9 : vector<8x256xf32> to vector<8x256xbf16>
    %c0_7 = arith.constant 0 : index
    %c0_8 = arith.constant 0 : index
    %11 = vector.load %arg6[%c0_7, %c0_8] : memref<256x128xbf16, #tpu.memory_space<vmem>>, vector<256x128xbf16>
    %cst_9 = arith.constant dense<0.000000e+00> : vector<8x128xf32>
    %12 = tpu.matmul %10, %11, %cst_9 {dimension_numbers = #tpu.dot_dimension_numbers<[1], [0], [0], [1], [0, 0, 1, 1], [], []>} : vector<8x256xbf16>, vector<256x128xbf16>, vector<8x128xf32> -> vector<8x128xf32>
    %c0_10 = arith.constant 0 : index
    %c0_11 = arith.constant 0 : index
    %13 = vector.load %arg7[%c0_10, %c0_11] : memref<1x128xf32, #tpu.memory_space<vmem>>, vector<1x128xf32>
    %14 = vector.broadcast %13 : vector<1x128xf32> to vector<8x128xf32>
    %15 = arith.addf %12, %14 : vector<8x128xf32>
    %16 = arith.addf %2, %15 : vector<8x128xf32>
    %c0_12 = arith.constant 0 : index
    %c0_13 = arith.constant 0 : index
    %17 = vector.load %arg8[%c0_12, %c0_13] : memref<1x128xf32, #tpu.memory_space<vmem>>, vector<1x128xf32>
    %c0_14 = arith.constant 0 : index
    %c0_15 = arith.constant 0 : index
    %18 = vector.load %arg9[%c0_14, %c0_15] : memref<1x128xf32, #tpu.memory_space<vmem>>, vector<1x128xf32>
    %cst_16 = arith.constant dense<0.000000e+00> : vector<8xf32>
    %19 = vector.multi_reduction <add>, %16, %cst_16 [1] : vector<8x128xf32> to vector<8xf32>
    %20 = vector.shape_cast %19 : vector<8xf32> to vector<8x1xf32>
    %cst_17 = arith.constant 1.280000e+02 : f32
    %21 = vector.broadcast %cst_17 : f32 to vector<8x1xf32>
    %22 = arith.divf %20, %21 : vector<8x1xf32>
    %23 = vector.broadcast %22 : vector<8x1xf32> to vector<8x128xf32>
    %24 = arith.subf %16, %23 : vector<8x128xf32>
    %25 = arith.mulf %24, %24 : vector<8x128xf32>
    %cst_18 = arith.constant dense<0.000000e+00> : vector<8xf32>
    %26 = vector.multi_reduction <add>, %25, %cst_18 [1] : vector<8x128xf32> to vector<8xf32>
    %27 = vector.shape_cast %26 : vector<8xf32> to vector<8x1xf32>
    %cst_19 = arith.constant 1.280000e+02 : f32
    %28 = vector.broadcast %cst_19 : f32 to vector<8x1xf32>
    %29 = arith.divf %27, %28 : vector<8x1xf32>
    %30 = vector.broadcast %22 : vector<8x1xf32> to vector<8x128xf32>
    %31 = arith.subf %16, %30 : vector<8x128xf32>
    %cst_20 = arith.constant 9.99999974E-6 : f32
    %32 = vector.broadcast %cst_20 : f32 to vector<8x1xf32>
    %33 = arith.addf %29, %32 : vector<8x1xf32>
    %34 = math.rsqrt %33 : vector<8x1xf32>
    %35 = vector.broadcast %34 : vector<8x1xf32> to vector<8x128xf32>
    %36 = arith.mulf %31, %35 : vector<8x128xf32>
    %37 = vector.broadcast %17 : vector<1x128xf32> to vector<8x128xf32>
    %38 = arith.mulf %36, %37 : vector<8x128xf32>
    %39 = vector.broadcast %18 : vector<1x128xf32> to vector<8x128xf32>
    %40 = arith.addf %38, %39 : vector<8x128xf32>
    %c0_21 = arith.constant 0 : index
    %c0_22 = arith.constant 0 : index
    %c0_23 = arith.constant 0 : index
    %41 = vector.load %arg3[%c0_21, %c0_22, %c0_23] : memref<1x8x1xf32, #tpu.memory_space<vmem>>, vector<1x8x1xf32>
    %42 = vector.shape_cast %41 : vector<1x8x1xf32> to vector<8x1xf32>
    %43 = vector.broadcast %42 : vector<8x1xf32> to vector<8x128xf32>
    %44 = arith.mulf %40, %43 : vector<8x128xf32>
    %45 = arith.truncf %44 : vector<8x128xf32> to vector<8x128xbf16>
    %c0_24 = arith.constant 0 : index
    %c0_25 = arith.constant 0 : index
    %c0_26 = arith.constant 0 : index
    %46 = vector.load %arg10[%c0_24, %c0_25, %c0_26] : memref<1x8x128xbf16, #tpu.memory_space<vmem>>, vector<1x8x128xbf16>
    %47 = vector.shape_cast %46 : vector<1x8x128xbf16> to vector<8x128xbf16>
    %48 = vector.shape_cast %45 : vector<8x128xbf16> to vector<1x8x128xbf16>
    tpu.vector_store %arg10[%c0_24, %c0_25, %c0_26], %48 {strides = array<i32>} : memref<1x8x128xbf16, #tpu.memory_space<vmem>>, vector<1x8x128xbf16>,
    return
  }
  func.func @transform_0(%arg0: i32, %arg1: i32) -> (i32, i32, i32) {
    %c0_i32 = arith.constant 0 : i32
    %c0_i32_0 = arith.constant 0 : i32
    return %arg0, %arg1, %c0_i32 : i32, i32, i32
  }
  func.func @transform_1(%arg0: i32, %arg1: i32) -> (i32, i32, i32) {
    %c0_i32 = arith.constant 0 : i32
    %c0_i32_0 = arith.constant 0 : i32
    return %arg0, %arg1, %c0_i32 : i32, i32, i32
  }
  func.func @transform_2(%arg0: i32, %arg1: i32) -> (i32, i32) {
    %c0_i32 = arith.constant 0 : i32
    %c0_i32_0 = arith.constant 0 : i32
    %c0_i32_1 = arith.constant 0 : i32
    return %c0_i32, %c0_i32_0 : i32, i32
  }
  func.func @transform_3(%arg0: i32, %arg1: i32) -> (i32, i32) {
    %c0_i32 = arith.constant 0 : i32
    %c0_i32_0 = arith.constant 0 : i32
    %c0_i32_1 = arith.constant 0 : i32
    return %c0_i32, %c0_i32_0 : i32, i32
  }
  func.func @transform_4(%arg0: i32, %arg1: i32) -> (i32, i32) {
    %c0_i32 = arith.constant 0 : i32
    %c0_i32_0 = arith.constant 0 : i32
    %c0_i32_1 = arith.constant 0 : i32
    return %c0_i32, %c0_i32_0 : i32, i32
  }
  func.func @transform_5(%arg0: i32, %arg1: i32) -> (i32, i32) {
    %c0_i32 = arith.constant 0 : i32
    %c0_i32_0 = arith.constant 0 : i32
    %c0_i32_1 = arith.constant 0 : i32
    return %c0_i32, %c0_i32_0 : i32, i32
  }
  func.func @transform_6(%arg0: i32, %arg1: i32) -> (i32, i32) {
    %c0_i32 = arith.constant 0 : i32
    %c0_i32_0 = arith.constant 0 : i32
    %c0_i32_1 = arith.constant 0 : i32
    return %c0_i32, %c0_i32_0 : i32, i32
  }
  func.func @transform_7(%arg0: i32, %arg1: i32) -> (i32, i32) {
    %c0_i32 = arith.constant 0 : i32
    %c0_i32_0 = arith.constant 0 : i32
    %c0_i32_1 = arith.constant 0 : i32
    return %c0_i32, %c0_i32_0 : i32, i32
  }
  func.func @transform_8(%arg0: i32, %arg1: i32) -> (i32, i32, i32) {
    %c0_i32 = arith.constant 0 : i32
    %c0_i32_0 = arith.constant 0 : i32
    return %arg0, %arg1, %c0_i32 : i32, i32, i32
  }
}

module attributes {stable_mosaic.version = 11 : i64} {
  func.func @_cross_mha_kernel(%arg0: i32, %arg1: i32, %arg2: memref<1x8x128xbf16, #tpu.memory_space<vmem>>, %arg3: memref<1x16x128xbf16, #tpu.memory_space<vmem>>, %arg4: memref<1x1x16xi32, #tpu.memory_space<vmem>>, %arg5: memref<1x8x1xf32, #tpu.memory_space<vmem>>, %arg6: memref<128x128xbf16, #tpu.memory_space<vmem>>, %arg7: memref<1x128xf32, #tpu.memory_space<vmem>>, %arg8: memref<128x256xbf16, #tpu.memory_space<vmem>>, %arg9: memref<1x256xf32, #tpu.memory_space<vmem>>, %arg10: memref<128x128xbf16, #tpu.memory_space<vmem>>, %arg11: memref<1x128xf32, #tpu.memory_space<vmem>>, %arg12: memref<1x128xf32, #tpu.memory_space<vmem>>, %arg13: memref<1x128xf32, #tpu.memory_space<vmem>>, %arg14: memref<1x128xf32, #tpu.memory_space<vmem>>, %arg15: memref<1x128xf32, #tpu.memory_space<vmem>>, %arg16: memref<1x8x128xbf16, #tpu.memory_space<vmem>>) attributes {dimension_semantics = [#tpu.dimension_semantics<parallel>, #tpu.dimension_semantics<parallel>], iteration_bounds = array<i64: 2, 1>, scalar_prefetch = 0 : i64, scratch_operands = 0 : i64, tpu.core_type = #tpu.core_type<tc>, window_params = [{transform_indices = @transform_0, window_bounds = array<i64: 1, 8, 128>}, {transform_indices = @transform_1, window_bounds = array<i64: 1, 16, 128>}, {transform_indices = @transform_2, window_bounds = array<i64: 1, 1, 16>}, {transform_indices = @transform_3, window_bounds = array<i64: 1, 8, 1>}, {pipeline_mode = #tpu.pipeline_mode<synchronous>, transform_indices = @transform_4, window_bounds = array<i64: 128, 128>}, {pipeline_mode = #tpu.pipeline_mode<synchronous>, transform_indices = @transform_5, window_bounds = array<i64: 1, 128>}, {pipeline_mode = #tpu.pipeline_mode<synchronous>, transform_indices = @transform_6, window_bounds = array<i64: 128, 256>}, {pipeline_mode = #tpu.pipeline_mode<synchronous>, transform_indices = @transform_7, window_bounds = array<i64: 1, 256>}, {pipeline_mode = #tpu.pipeline_mode<synchronous>, transform_indices = @transform_8, window_bounds = array<i64: 128, 128>}, {pipeline_mode = #tpu.pipeline_mode<synchronous>, transform_indices = @transform_9, window_bounds = array<i64: 1, 128>}, {pipeline_mode = #tpu.pipeline_mode<synchronous>, transform_indices = @transform_10, window_bounds = array<i64: 1, 128>}, {pipeline_mode = #tpu.pipeline_mode<synchronous>, transform_indices = @transform_11, window_bounds = array<i64: 1, 128>}, {pipeline_mode = #tpu.pipeline_mode<synchronous>, transform_indices = @transform_12, window_bounds = array<i64: 1, 128>}, {pipeline_mode = #tpu.pipeline_mode<synchronous>, transform_indices = @transform_13, window_bounds = array<i64: 1, 128>}, {transform_indices = @transform_14, window_bounds = array<i64: 1, 8, 128>}]} {
    %c0 = arith.constant 0 : index
    %c0_0 = arith.constant 0 : index
    %c0_1 = arith.constant 0 : index
    %0 = vector.load %arg2[%c0, %c0_0, %c0_1] : memref<1x8x128xbf16, #tpu.memory_space<vmem>>, vector<1x8x128xbf16>
    %1 = vector.shape_cast %0 : vector<1x8x128xbf16> to vector<8x128xbf16>
    %2 = arith.extf %1 : vector<8x128xbf16> to vector<8x128xf32>
    %c0_2 = arith.constant 0 : index
    %c0_3 = arith.constant 0 : index
    %c0_4 = arith.constant 0 : index
    %3 = vector.load %arg3[%c0_2, %c0_3, %c0_4] : memref<1x16x128xbf16, #tpu.memory_space<vmem>>, vector<1x16x128xbf16>
    %4 = vector.shape_cast %3 : vector<1x16x128xbf16> to vector<16x128xbf16>
    %c0_5 = arith.constant 0 : index
    %c0_6 = arith.constant 0 : index
    %5 = vector.load %arg6[%c0_5, %c0_6] : memref<128x128xbf16, #tpu.memory_space<vmem>>, vector<128x128xbf16>
    %cst = arith.constant dense<0.000000e+00> : vector<8x128xf32>
    %6 = tpu.matmul %1, %5, %cst {dimension_numbers = #tpu.dot_dimension_numbers<[1], [0], [0], [1], [0, 0, 1, 1], [], []>} : vector<8x128xbf16>, vector<128x128xbf16>, vector<8x128xf32> -> vector<8x128xf32>
    %c0_7 = arith.constant 0 : index
    %c0_8 = arith.constant 0 : index
    %7 = vector.load %arg7[%c0_7, %c0_8] : memref<1x128xf32, #tpu.memory_space<vmem>>, vector<1x128xf32>
    %8 = vector.broadcast %7 : vector<1x128xf32> to vector<8x128xf32>
    %9 = arith.addf %6, %8 : vector<8x128xf32>
    %c0_9 = arith.constant 0 : index
    %c0_10 = arith.constant 0 : index
    %10 = vector.load %arg8[%c0_9, %c0_10] : memref<128x256xbf16, #tpu.memory_space<vmem>>, vector<128x256xbf16>
    %cst_11 = arith.constant dense<0.000000e+00> : vector<16x256xf32>
    %11 = tpu.matmul %4, %10, %cst_11 {dimension_numbers = #tpu.dot_dimension_numbers<[1], [0], [0], [1], [0, 0, 1, 1], [], []>} : vector<16x128xbf16>, vector<128x256xbf16>, vector<16x256xf32> -> vector<16x256xf32>
    %c0_12 = arith.constant 0 : index
    %c0_13 = arith.constant 0 : index
    %12 = vector.load %arg9[%c0_12, %c0_13] : memref<1x256xf32, #tpu.memory_space<vmem>>, vector<1x256xf32>
    %13 = vector.broadcast %12 : vector<1x256xf32> to vector<16x256xf32>
    %14 = arith.addf %11, %13 : vector<16x256xf32>
    %15 = vector.extract_strided_slice %14 {offsets = [0, 0], sizes = [16, 128], strides = [1, 1]} : vector<16x256xf32> to vector<16x128xf32>
    %16 = vector.extract_strided_slice %14 {offsets = [0, 128], sizes = [16, 128], strides = [1, 1]} : vector<16x256xf32> to vector<16x128xf32>
    %c0_14 = arith.constant 0 : index
    %c0_15 = arith.constant 0 : index
    %c0_16 = arith.constant 0 : index
    %17 = vector.load %arg4[%c0_14, %c0_15, %c0_16] : memref<1x1x16xi32, #tpu.memory_space<vmem>>, vector<1x1x16xi32>
    %18 = vector.shape_cast %17 : vector<1x1x16xi32> to vector<1x16xi32>
    %c0_i32 = arith.constant 0 : i32
    %19 = vector.broadcast %c0_i32 : i32 to vector<1x16xi32>
    %20 = arith.cmpi eq, %18, %19 : vector<1x16xi32>
    %cst_17 = arith.constant -1.000000e+09 : f32
    %cst_18 = arith.constant 0.000000e+00 : f32
    %21 = vector.broadcast %cst_17 : f32 to vector<1x16xf32>
    %22 = vector.broadcast %cst_18 : f32 to vector<1x16xf32>
    %23 = arith.select %20, %21, %22 : vector<1x16xi1>, vector<1x16xf32>
    %24 = vector.shape_cast %23 : vector<1x16xf32> to vector<1x16xf32>
    %25 = vector.broadcast %24 : vector<1x16xf32> to vector<8x16xf32>
    %26 = vector.extract_strided_slice %9 {offsets = [0, 0], sizes = [8, 32], strides = [1, 1]} : vector<8x128xf32> to vector<8x32xf32>
    %27 = arith.truncf %26 : vector<8x32xf32> to vector<8x32xbf16>
    %28 = vector.extract_strided_slice %15 {offsets = [0, 0], sizes = [16, 32], strides = [1, 1]} : vector<16x128xf32> to vector<16x32xf32>
    %29 = arith.truncf %28 : vector<16x32xf32> to vector<16x32xbf16>
    %30 = vector.extract_strided_slice %16 {offsets = [0, 0], sizes = [16, 32], strides = [1, 1]} : vector<16x128xf32> to vector<16x32xf32>
    %31 = arith.truncf %30 : vector<16x32xf32> to vector<16x32xbf16>
    %cst_19 = arith.constant dense<0.000000e+00> : vector<8x16xf32>
    %32 = tpu.matmul %27, %29, %cst_19 {dimension_numbers = #tpu.dot_dimension_numbers<[1], [1], [0], [0], [0, 0, 1, 0], [], []>} : vector<8x32xbf16>, vector<16x32xbf16>, vector<8x16xf32> -> vector<8x16xf32>
    %cst_20 = arith.constant 0.176776692 : f32
    %33 = vector.broadcast %cst_20 : f32 to vector<8x16xf32>
    %34 = arith.mulf %32, %33 : vector<8x16xf32>
    %35 = arith.addf %34, %25 : vector<8x16xf32>
    %cst_21 = arith.constant dense<0xFF800000> : vector<8xf32>
    %36 = vector.multi_reduction <maximumf>, %35, %cst_21 [1] : vector<8x16xf32> to vector<8xf32>
    %37 = vector.shape_cast %36 : vector<8xf32> to vector<8x1xf32>
    %38 = vector.broadcast %37 : vector<8x1xf32> to vector<8x16xf32>
    %39 = arith.subf %35, %38 : vector<8x16xf32>
    %40 = math.exp %39 : vector<8x16xf32>
    %cst_22 = arith.constant dense<0.000000e+00> : vector<8xf32>
    %41 = vector.multi_reduction <add>, %40, %cst_22 [1] : vector<8x16xf32> to vector<8xf32>
    %42 = vector.shape_cast %41 : vector<8xf32> to vector<8x1xf32>
    %43 = tpu.reciprocal %42 {approx = true} : vector<8x1xf32> -> vector<8x1xf32>
    %44 = vector.broadcast %43 : vector<8x1xf32> to vector<8x16xf32>
    %45 = arith.mulf %40, %44 : vector<8x16xf32>
    %46 = arith.truncf %45 : vector<8x16xf32> to vector<8x16xbf16>
    %cst_23 = arith.constant dense<0.000000e+00> : vector<8x32xf32>
    %47 = tpu.matmul %46, %31, %cst_23 {dimension_numbers = #tpu.dot_dimension_numbers<[1], [0], [0], [1], [0, 0, 1, 1], [], []>} : vector<8x16xbf16>, vector<16x32xbf16>, vector<8x32xf32> -> vector<8x32xf32>
    %48 = vector.extract_strided_slice %9 {offsets = [0, 32], sizes = [8, 32], strides = [1, 1]} : vector<8x128xf32> to vector<8x32xf32>
    %49 = arith.truncf %48 : vector<8x32xf32> to vector<8x32xbf16>
    %50 = vector.extract_strided_slice %15 {offsets = [0, 32], sizes = [16, 32], strides = [1, 1]} : vector<16x128xf32> to vector<16x32xf32>
    %51 = arith.truncf %50 : vector<16x32xf32> to vector<16x32xbf16>
    %52 = vector.extract_strided_slice %16 {offsets = [0, 32], sizes = [16, 32], strides = [1, 1]} : vector<16x128xf32> to vector<16x32xf32>
    %53 = arith.truncf %52 : vector<16x32xf32> to vector<16x32xbf16>
    %cst_24 = arith.constant dense<0.000000e+00> : vector<8x16xf32>
    %54 = tpu.matmul %49, %51, %cst_24 {dimension_numbers = #tpu.dot_dimension_numbers<[1], [1], [0], [0], [0, 0, 1, 0], [], []>} : vector<8x32xbf16>, vector<16x32xbf16>, vector<8x16xf32> -> vector<8x16xf32>
    %cst_25 = arith.constant 0.176776692 : f32
    %55 = vector.broadcast %cst_25 : f32 to vector<8x16xf32>
    %56 = arith.mulf %54, %55 : vector<8x16xf32>
    %57 = arith.addf %56, %25 : vector<8x16xf32>
    %cst_26 = arith.constant dense<0xFF800000> : vector<8xf32>
    %58 = vector.multi_reduction <maximumf>, %57, %cst_26 [1] : vector<8x16xf32> to vector<8xf32>
    %59 = vector.shape_cast %58 : vector<8xf32> to vector<8x1xf32>
    %60 = vector.broadcast %59 : vector<8x1xf32> to vector<8x16xf32>
    %61 = arith.subf %57, %60 : vector<8x16xf32>
    %62 = math.exp %61 : vector<8x16xf32>
    %cst_27 = arith.constant dense<0.000000e+00> : vector<8xf32>
    %63 = vector.multi_reduction <add>, %62, %cst_27 [1] : vector<8x16xf32> to vector<8xf32>
    %64 = vector.shape_cast %63 : vector<8xf32> to vector<8x1xf32>
    %65 = tpu.reciprocal %64 {approx = true} : vector<8x1xf32> -> vector<8x1xf32>
    %66 = vector.broadcast %65 : vector<8x1xf32> to vector<8x16xf32>
    %67 = arith.mulf %62, %66 : vector<8x16xf32>
    %68 = arith.truncf %67 : vector<8x16xf32> to vector<8x16xbf16>
    %cst_28 = arith.constant dense<0.000000e+00> : vector<8x32xf32>
    %69 = tpu.matmul %68, %53, %cst_28 {dimension_numbers = #tpu.dot_dimension_numbers<[1], [0], [0], [1], [0, 0, 1, 1], [], []>} : vector<8x16xbf16>, vector<16x32xbf16>, vector<8x32xf32> -> vector<8x32xf32>
    %70 = vector.extract_strided_slice %9 {offsets = [0, 64], sizes = [8, 32], strides = [1, 1]} : vector<8x128xf32> to vector<8x32xf32>
    %71 = arith.truncf %70 : vector<8x32xf32> to vector<8x32xbf16>
    %72 = vector.extract_strided_slice %15 {offsets = [0, 64], sizes = [16, 32], strides = [1, 1]} : vector<16x128xf32> to vector<16x32xf32>
    %73 = arith.truncf %72 : vector<16x32xf32> to vector<16x32xbf16>
    %74 = vector.extract_strided_slice %16 {offsets = [0, 64], sizes = [16, 32], strides = [1, 1]} : vector<16x128xf32> to vector<16x32xf32>
    %75 = arith.truncf %74 : vector<16x32xf32> to vector<16x32xbf16>
    %cst_29 = arith.constant dense<0.000000e+00> : vector<8x16xf32>
    %76 = tpu.matmul %71, %73, %cst_29 {dimension_numbers = #tpu.dot_dimension_numbers<[1], [1], [0], [0], [0, 0, 1, 0], [], []>} : vector<8x32xbf16>, vector<16x32xbf16>, vector<8x16xf32> -> vector<8x16xf32>
    %cst_30 = arith.constant 0.176776692 : f32
    %77 = vector.broadcast %cst_30 : f32 to vector<8x16xf32>
    %78 = arith.mulf %76, %77 : vector<8x16xf32>
    %79 = arith.addf %78, %25 : vector<8x16xf32>
    %cst_31 = arith.constant dense<0xFF800000> : vector<8xf32>
    %80 = vector.multi_reduction <maximumf>, %79, %cst_31 [1] : vector<8x16xf32> to vector<8xf32>
    %81 = vector.shape_cast %80 : vector<8xf32> to vector<8x1xf32>
    %82 = vector.broadcast %81 : vector<8x1xf32> to vector<8x16xf32>
    %83 = arith.subf %79, %82 : vector<8x16xf32>
    %84 = math.exp %83 : vector<8x16xf32>
    %cst_32 = arith.constant dense<0.000000e+00> : vector<8xf32>
    %85 = vector.multi_reduction <add>, %84, %cst_32 [1] : vector<8x16xf32> to vector<8xf32>
    %86 = vector.shape_cast %85 : vector<8xf32> to vector<8x1xf32>
    %87 = tpu.reciprocal %86 {approx = true} : vector<8x1xf32> -> vector<8x1xf32>
    %88 = vector.broadcast %87 : vector<8x1xf32> to vector<8x16xf32>
    %89 = arith.mulf %84, %88 : vector<8x16xf32>
    %90 = arith.truncf %89 : vector<8x16xf32> to vector<8x16xbf16>
    %cst_33 = arith.constant dense<0.000000e+00> : vector<8x32xf32>
    %91 = tpu.matmul %90, %75, %cst_33 {dimension_numbers = #tpu.dot_dimension_numbers<[1], [0], [0], [1], [0, 0, 1, 1], [], []>} : vector<8x16xbf16>, vector<16x32xbf16>, vector<8x32xf32> -> vector<8x32xf32>
    %92 = vector.extract_strided_slice %9 {offsets = [0, 96], sizes = [8, 32], strides = [1, 1]} : vector<8x128xf32> to vector<8x32xf32>
    %93 = arith.truncf %92 : vector<8x32xf32> to vector<8x32xbf16>
    %94 = vector.extract_strided_slice %15 {offsets = [0, 96], sizes = [16, 32], strides = [1, 1]} : vector<16x128xf32> to vector<16x32xf32>
    %95 = arith.truncf %94 : vector<16x32xf32> to vector<16x32xbf16>
    %96 = vector.extract_strided_slice %16 {offsets = [0, 96], sizes = [16, 32], strides = [1, 1]} : vector<16x128xf32> to vector<16x32xf32>
    %97 = arith.truncf %96 : vector<16x32xf32> to vector<16x32xbf16>
    %cst_34 = arith.constant dense<0.000000e+00> : vector<8x16xf32>
    %98 = tpu.matmul %93, %95, %cst_34 {dimension_numbers = #tpu.dot_dimension_numbers<[1], [1], [0], [0], [0, 0, 1, 0], [], []>} : vector<8x32xbf16>, vector<16x32xbf16>, vector<8x16xf32> -> vector<8x16xf32>
    %cst_35 = arith.constant 0.176776692 : f32
    %99 = vector.broadcast %cst_35 : f32 to vector<8x16xf32>
    %100 = arith.mulf %98, %99 : vector<8x16xf32>
    %101 = arith.addf %100, %25 : vector<8x16xf32>
    %cst_36 = arith.constant dense<0xFF800000> : vector<8xf32>
    %102 = vector.multi_reduction <maximumf>, %101, %cst_36 [1] : vector<8x16xf32> to vector<8xf32>
    %103 = vector.shape_cast %102 : vector<8xf32> to vector<8x1xf32>
    %104 = vector.broadcast %103 : vector<8x1xf32> to vector<8x16xf32>
    %105 = arith.subf %101, %104 : vector<8x16xf32>
    %106 = math.exp %105 : vector<8x16xf32>
    %cst_37 = arith.constant dense<0.000000e+00> : vector<8xf32>
    %107 = vector.multi_reduction <add>, %106, %cst_37 [1] : vector<8x16xf32> to vector<8xf32>
    %108 = vector.shape_cast %107 : vector<8xf32> to vector<8x1xf32>
    %109 = tpu.reciprocal %108 {approx = true} : vector<8x1xf32> -> vector<8x1xf32>
    %110 = vector.broadcast %109 : vector<8x1xf32> to vector<8x16xf32>
    %111 = arith.mulf %106, %110 : vector<8x16xf32>
    %112 = arith.truncf %111 : vector<8x16xf32> to vector<8x16xbf16>
    %cst_38 = arith.constant dense<0.000000e+00> : vector<8x32xf32>
    %113 = tpu.matmul %112, %97, %cst_38 {dimension_numbers = #tpu.dot_dimension_numbers<[1], [0], [0], [1], [0, 0, 1, 1], [], []>} : vector<8x16xbf16>, vector<16x32xbf16>, vector<8x32xf32> -> vector<8x32xf32>
    %114 = tpu.concatenate %47, %69, %91, %113 in 1 : vector<8x32xf32>, vector<8x32xf32>, vector<8x32xf32>, vector<8x32xf32> -> vector<8x128xf32>
    %115 = arith.truncf %114 : vector<8x128xf32> to vector<8x128xbf16>
    %c0_39 = arith.constant 0 : index
    %c0_40 = arith.constant 0 : index
    %116 = vector.load %arg10[%c0_39, %c0_40] : memref<128x128xbf16, #tpu.memory_space<vmem>>, vector<128x128xbf16>
    %cst_41 = arith.constant dense<0.000000e+00> : vector<8x128xf32>
    %117 = tpu.matmul %115, %116, %cst_41 {dimension_numbers = #tpu.dot_dimension_numbers<[1], [0], [0], [1], [0, 0, 1, 1], [], []>} : vector<8x128xbf16>, vector<128x128xbf16>, vector<8x128xf32> -> vector<8x128xf32>
    %c0_42 = arith.constant 0 : index
    %c0_43 = arith.constant 0 : index
    %118 = vector.load %arg11[%c0_42, %c0_43] : memref<1x128xf32, #tpu.memory_space<vmem>>, vector<1x128xf32>
    %119 = vector.broadcast %118 : vector<1x128xf32> to vector<8x128xf32>
    %120 = arith.addf %117, %119 : vector<8x128xf32>
    %121 = arith.addf %2, %120 : vector<8x128xf32>
    %c0_44 = arith.constant 0 : index
    %c0_45 = arith.constant 0 : index
    %122 = vector.load %arg12[%c0_44, %c0_45] : memref<1x128xf32, #tpu.memory_space<vmem>>, vector<1x128xf32>
    %c0_46 = arith.constant 0 : index
    %c0_47 = arith.constant 0 : index
    %123 = vector.load %arg13[%c0_46, %c0_47] : memref<1x128xf32, #tpu.memory_space<vmem>>, vector<1x128xf32>
    %cst_48 = arith.constant dense<0.000000e+00> : vector<8xf32>
    %124 = vector.multi_reduction <add>, %121, %cst_48 [1] : vector<8x128xf32> to vector<8xf32>
    %125 = vector.shape_cast %124 : vector<8xf32> to vector<8x1xf32>
    %cst_49 = arith.constant 1.280000e+02 : f32
    %126 = vector.broadcast %cst_49 : f32 to vector<8x1xf32>
    %127 = arith.divf %125, %126 : vector<8x1xf32>
    %128 = vector.broadcast %127 : vector<8x1xf32> to vector<8x128xf32>
    %129 = arith.subf %121, %128 : vector<8x128xf32>
    %130 = arith.mulf %129, %129 : vector<8x128xf32>
    %cst_50 = arith.constant dense<0.000000e+00> : vector<8xf32>
    %131 = vector.multi_reduction <add>, %130, %cst_50 [1] : vector<8x128xf32> to vector<8xf32>
    %132 = vector.shape_cast %131 : vector<8xf32> to vector<8x1xf32>
    %cst_51 = arith.constant 1.280000e+02 : f32
    %133 = vector.broadcast %cst_51 : f32 to vector<8x1xf32>
    %134 = arith.divf %132, %133 : vector<8x1xf32>
    %135 = vector.broadcast %127 : vector<8x1xf32> to vector<8x128xf32>
    %136 = arith.subf %121, %135 : vector<8x128xf32>
    %cst_52 = arith.constant 9.99999974E-6 : f32
    %137 = vector.broadcast %cst_52 : f32 to vector<8x1xf32>
    %138 = arith.addf %134, %137 : vector<8x1xf32>
    %139 = math.rsqrt %138 : vector<8x1xf32>
    %140 = vector.broadcast %139 : vector<8x1xf32> to vector<8x128xf32>
    %141 = arith.mulf %136, %140 : vector<8x128xf32>
    %142 = vector.broadcast %122 : vector<1x128xf32> to vector<8x128xf32>
    %143 = arith.mulf %141, %142 : vector<8x128xf32>
    %144 = vector.broadcast %123 : vector<1x128xf32> to vector<8x128xf32>
    %145 = arith.addf %143, %144 : vector<8x128xf32>
    %146 = arith.addf %2, %145 : vector<8x128xf32>
    %c0_53 = arith.constant 0 : index
    %c0_54 = arith.constant 0 : index
    %147 = vector.load %arg14[%c0_53, %c0_54] : memref<1x128xf32, #tpu.memory_space<vmem>>, vector<1x128xf32>
    %c0_55 = arith.constant 0 : index
    %c0_56 = arith.constant 0 : index
    %148 = vector.load %arg15[%c0_55, %c0_56] : memref<1x128xf32, #tpu.memory_space<vmem>>, vector<1x128xf32>
    %cst_57 = arith.constant dense<0.000000e+00> : vector<8xf32>
    %149 = vector.multi_reduction <add>, %146, %cst_57 [1] : vector<8x128xf32> to vector<8xf32>
    %150 = vector.shape_cast %149 : vector<8xf32> to vector<8x1xf32>
    %cst_58 = arith.constant 1.280000e+02 : f32
    %151 = vector.broadcast %cst_58 : f32 to vector<8x1xf32>
    %152 = arith.divf %150, %151 : vector<8x1xf32>
    %153 = vector.broadcast %152 : vector<8x1xf32> to vector<8x128xf32>
    %154 = arith.subf %146, %153 : vector<8x128xf32>
    %155 = arith.mulf %154, %154 : vector<8x128xf32>
    %cst_59 = arith.constant dense<0.000000e+00> : vector<8xf32>
    %156 = vector.multi_reduction <add>, %155, %cst_59 [1] : vector<8x128xf32> to vector<8xf32>
    %157 = vector.shape_cast %156 : vector<8xf32> to vector<8x1xf32>
    %cst_60 = arith.constant 1.280000e+02 : f32
    %158 = vector.broadcast %cst_60 : f32 to vector<8x1xf32>
    %159 = arith.divf %157, %158 : vector<8x1xf32>
    %160 = vector.broadcast %152 : vector<8x1xf32> to vector<8x128xf32>
    %161 = arith.subf %146, %160 : vector<8x128xf32>
    %cst_61 = arith.constant 9.99999974E-6 : f32
    %162 = vector.broadcast %cst_61 : f32 to vector<8x1xf32>
    %163 = arith.addf %159, %162 : vector<8x1xf32>
    %164 = math.rsqrt %163 : vector<8x1xf32>
    %165 = vector.broadcast %164 : vector<8x1xf32> to vector<8x128xf32>
    %166 = arith.mulf %161, %165 : vector<8x128xf32>
    %167 = vector.broadcast %147 : vector<1x128xf32> to vector<8x128xf32>
    %168 = arith.mulf %166, %167 : vector<8x128xf32>
    %169 = vector.broadcast %148 : vector<1x128xf32> to vector<8x128xf32>
    %170 = arith.addf %168, %169 : vector<8x128xf32>
    %c0_62 = arith.constant 0 : index
    %c0_63 = arith.constant 0 : index
    %c0_64 = arith.constant 0 : index
    %171 = vector.load %arg5[%c0_62, %c0_63, %c0_64] : memref<1x8x1xf32, #tpu.memory_space<vmem>>, vector<1x8x1xf32>
    %172 = vector.shape_cast %171 : vector<1x8x1xf32> to vector<8x1xf32>
    %173 = vector.broadcast %172 : vector<8x1xf32> to vector<8x128xf32>
    %174 = arith.mulf %170, %173 : vector<8x128xf32>
    %175 = arith.truncf %174 : vector<8x128xf32> to vector<8x128xbf16>
    %c0_65 = arith.constant 0 : index
    %c0_66 = arith.constant 0 : index
    %c0_67 = arith.constant 0 : index
    %176 = vector.load %arg16[%c0_65, %c0_66, %c0_67] : memref<1x8x128xbf16, #tpu.memory_space<vmem>>, vector<1x8x128xbf16>
    %177 = vector.shape_cast %176 : vector<1x8x128xbf16> to vector<8x128xbf16>
    %178 = vector.shape_cast %175 : vector<8x128xbf16> to vector<1x8x128xbf16>
    tpu.vector_store %arg16[%c0_65, %c0_66, %c0_67], %178 {strides = array<i32>} : memref<1x8x128xbf16, #tpu.memory_space<vmem>>, vector<1x8x128xbf16>,
    return
  }
  func.func @transform_0(%arg0: i32, %arg1: i32) -> (i32, i32, i32) {
    %c0_i32 = arith.constant 0 : i32
    %c0_i32_0 = arith.constant 0 : i32
    return %arg0, %arg1, %c0_i32 : i32, i32, i32
  }
  func.func @transform_1(%arg0: i32, %arg1: i32) -> (i32, i32, i32) {
    %c0_i32 = arith.constant 0 : i32
    %c0_i32_0 = arith.constant 0 : i32
    %c0_i32_1 = arith.constant 0 : i32
    return %arg0, %c0_i32, %c0_i32_0 : i32, i32, i32
  }
  func.func @transform_2(%arg0: i32, %arg1: i32) -> (i32, i32, i32) {
    %c0_i32 = arith.constant 0 : i32
    %c0_i32_0 = arith.constant 0 : i32
    %c0_i32_1 = arith.constant 0 : i32
    return %arg0, %c0_i32, %c0_i32_0 : i32, i32, i32
  }
  func.func @transform_3(%arg0: i32, %arg1: i32) -> (i32, i32, i32) {
    %c0_i32 = arith.constant 0 : i32
    %c0_i32_0 = arith.constant 0 : i32
    return %arg0, %arg1, %c0_i32 : i32, i32, i32
  }
  func.func @transform_4(%arg0: i32, %arg1: i32) -> (i32, i32) {
    %c0_i32 = arith.constant 0 : i32
    %c0_i32_0 = arith.constant 0 : i32
    %c0_i32_1 = arith.constant 0 : i32
    return %c0_i32, %c0_i32_0 : i32, i32
  }
  func.func @transform_5(%arg0: i32, %arg1: i32) -> (i32, i32) {
    %c0_i32 = arith.constant 0 : i32
    %c0_i32_0 = arith.constant 0 : i32
    %c0_i32_1 = arith.constant 0 : i32
    return %c0_i32, %c0_i32_0 : i32, i32
  }
  func.func @transform_6(%arg0: i32, %arg1: i32) -> (i32, i32) {
    %c0_i32 = arith.constant 0 : i32
    %c0_i32_0 = arith.constant 0 : i32
    %c0_i32_1 = arith.constant 0 : i32
    return %c0_i32, %c0_i32_0 : i32, i32
  }
  func.func @transform_7(%arg0: i32, %arg1: i32) -> (i32, i32) {
    %c0_i32 = arith.constant 0 : i32
    %c0_i32_0 = arith.constant 0 : i32
    %c0_i32_1 = arith.constant 0 : i32
    return %c0_i32, %c0_i32_0 : i32, i32
  }
  func.func @transform_8(%arg0: i32, %arg1: i32) -> (i32, i32) {
    %c0_i32 = arith.constant 0 : i32
    %c0_i32_0 = arith.constant 0 : i32
    %c0_i32_1 = arith.constant 0 : i32
    return %c0_i32, %c0_i32_0 : i32, i32
  }
  func.func @transform_9(%arg0: i32, %arg1: i32) -> (i32, i32) {
    %c0_i32 = arith.constant 0 : i32
    %c0_i32_0 = arith.constant 0 : i32
    %c0_i32_1 = arith.constant 0 : i32
    return %c0_i32, %c0_i32_0 : i32, i32
  }
  func.func @transform_10(%arg0: i32, %arg1: i32) -> (i32, i32) {
    %c0_i32 = arith.constant 0 : i32
    %c0_i32_0 = arith.constant 0 : i32
    %c0_i32_1 = arith.constant 0 : i32
    return %c0_i32, %c0_i32_0 : i32, i32
  }
  func.func @transform_11(%arg0: i32, %arg1: i32) -> (i32, i32) {
    %c0_i32 = arith.constant 0 : i32
    %c0_i32_0 = arith.constant 0 : i32
    %c0_i32_1 = arith.constant 0 : i32
    return %c0_i32, %c0_i32_0 : i32, i32
  }
  func.func @transform_12(%arg0: i32, %arg1: i32) -> (i32, i32) {
    %c0_i32 = arith.constant 0 : i32
    %c0_i32_0 = arith.constant 0 : i32
    %c0_i32_1 = arith.constant 0 : i32
    return %c0_i32, %c0_i32_0 : i32, i32
  }
  func.func @transform_13(%arg0: i32, %arg1: i32) -> (i32, i32) {
    %c0_i32 = arith.constant 0 : i32
    %c0_i32_0 = arith.constant 0 : i32
    %c0_i32_1 = arith.constant 0 : i32
    return %c0_i32, %c0_i32_0 : i32, i32
  }
  func.func @transform_14(%arg0: i32, %arg1: i32) -> (i32, i32, i32) {
    %c0_i32 = arith.constant 0 : i32
    %c0_i32_0 = arith.constant 0 : i32
    return %arg0, %arg1, %c0_i32 : i32, i32, i32
  }
}

module attributes {stable_mosaic.version = 11 : i64} {
  func.func @_fc_logsoftmax_kernel(%arg0: i32, %arg1: i32, %arg2: memref<1x8x128xbf16, #tpu.memory_space<vmem>>, %arg3: memref<128x128xbf16, #tpu.memory_space<vmem>>, %arg4: memref<1x8x128xf32, #tpu.memory_space<vmem>>) attributes {dimension_semantics = [#tpu.dimension_semantics<parallel>, #tpu.dimension_semantics<parallel>], iteration_bounds = array<i64: 2, 1>, scalar_prefetch = 0 : i64, scratch_operands = 0 : i64, tpu.core_type = #tpu.core_type<tc>, window_params = [{transform_indices = @transform_0, window_bounds = array<i64: 1, 8, 128>}, {pipeline_mode = #tpu.pipeline_mode<synchronous>, transform_indices = @transform_1, window_bounds = array<i64: 128, 128>}, {transform_indices = @transform_2, window_bounds = array<i64: 1, 8, 128>}]} {
    %c0 = arith.constant 0 : index
    %c0_0 = arith.constant 0 : index
    %c0_1 = arith.constant 0 : index
    %0 = vector.load %arg2[%c0, %c0_0, %c0_1] : memref<1x8x128xbf16, #tpu.memory_space<vmem>>, vector<1x8x128xbf16>
    %1 = vector.shape_cast %0 : vector<1x8x128xbf16> to vector<8x128xbf16>
    %c0_2 = arith.constant 0 : index
    %c0_3 = arith.constant 0 : index
    %2 = vector.load %arg3[%c0_2, %c0_3] : memref<128x128xbf16, #tpu.memory_space<vmem>>, vector<128x128xbf16>
    %cst = arith.constant dense<0.000000e+00> : vector<8x128xf32>
    %3 = tpu.matmul %1, %2, %cst {dimension_numbers = #tpu.dot_dimension_numbers<[1], [0], [0], [1], [0, 0, 1, 1], [], []>} : vector<8x128xbf16>, vector<128x128xbf16>, vector<8x128xf32> -> vector<8x128xf32>
    %cst_4 = arith.constant dense<0xFF800000> : vector<8xf32>
    %4 = vector.multi_reduction <maximumf>, %3, %cst_4 [1] : vector<8x128xf32> to vector<8xf32>
    %5 = vector.shape_cast %4 : vector<8xf32> to vector<8x1xf32>
    %6 = vector.broadcast %5 : vector<8x1xf32> to vector<8x128xf32>
    %7 = arith.subf %3, %6 : vector<8x128xf32>
    %8 = math.exp %7 : vector<8x128xf32>
    %cst_5 = arith.constant dense<0.000000e+00> : vector<8xf32>
    %9 = vector.multi_reduction <add>, %8, %cst_5 [1] : vector<8x128xf32> to vector<8xf32>
    %10 = vector.shape_cast %9 : vector<8xf32> to vector<8x1xf32>
    %11 = math.log %10 : vector<8x1xf32>
    %12 = vector.broadcast %11 : vector<8x1xf32> to vector<8x128xf32>
    %13 = arith.subf %7, %12 : vector<8x128xf32>
    %c0_6 = arith.constant 0 : index
    %c0_7 = arith.constant 0 : index
    %c0_8 = arith.constant 0 : index
    %14 = vector.load %arg4[%c0_6, %c0_7, %c0_8] : memref<1x8x128xf32, #tpu.memory_space<vmem>>, vector<1x8x128xf32>
    %15 = vector.shape_cast %14 : vector<1x8x128xf32> to vector<8x128xf32>
    %16 = vector.shape_cast %13 : vector<8x128xf32> to vector<1x8x128xf32>
    tpu.vector_store %arg4[%c0_6, %c0_7, %c0_8], %16 {strides = array<i32>} : memref<1x8x128xf32, #tpu.memory_space<vmem>>, vector<1x8x128xf32>,
    return
  }
  func.func @transform_0(%arg0: i32, %arg1: i32) -> (i32, i32, i32) {
    %c0_i32 = arith.constant 0 : i32
    %c0_i32_0 = arith.constant 0 : i32
    return %arg0, %arg1, %c0_i32 : i32, i32, i32
  }
  func.func @transform_1(%arg0: i32, %arg1: i32) -> (i32, i32) {
    %c0_i32 = arith.constant 0 : i32
    %c0_i32_0 = arith.constant 0 : i32
    %c0_i32_1 = arith.constant 0 : i32
    return %c0_i32, %c0_i32_0 : i32, i32
  }
  func.func @transform_2(%arg0: i32, %arg1: i32) -> (i32, i32, i32) {
    %c0_i32 = arith.constant 0 : i32
    %c0_i32_0 = arith.constant 0 : i32
    return %arg0, %arg1, %c0_i32 : i32, i32, i32
  }
}

module attributes {stable_mosaic.version = 11 : i64} {
  func.func @_self_mha_kernel(%arg0: i32, %arg1: memref<1x8x128xbf16, #tpu.memory_space<vmem>>, %arg2: memref<1x1x8xi32, #tpu.memory_space<vmem>>, %arg3: memref<1x8x1xf32, #tpu.memory_space<vmem>>, %arg4: memref<128x384xbf16, #tpu.memory_space<vmem>>, %arg5: memref<1x384xf32, #tpu.memory_space<vmem>>, %arg6: memref<128x128xbf16, #tpu.memory_space<vmem>>, %arg7: memref<1x128xf32, #tpu.memory_space<vmem>>, %arg8: memref<1x128xf32, #tpu.memory_space<vmem>>, %arg9: memref<1x128xf32, #tpu.memory_space<vmem>>, %arg10: memref<1x128xf32, #tpu.memory_space<vmem>>, %arg11: memref<1x128xf32, #tpu.memory_space<vmem>>, %arg12: memref<1x8x128xbf16, #tpu.memory_space<vmem>>) attributes {dimension_semantics = [#tpu.dimension_semantics<parallel>], iteration_bounds = array<i64: 2>, scalar_prefetch = 0 : i64, scratch_operands = 0 : i64, tpu.core_type = #tpu.core_type<tc>, window_params = [{transform_indices = @transform_0, window_bounds = array<i64: 1, 8, 128>}, {transform_indices = @transform_1, window_bounds = array<i64: 1, 1, 8>}, {transform_indices = @transform_2, window_bounds = array<i64: 1, 8, 1>}, {pipeline_mode = #tpu.pipeline_mode<synchronous>, transform_indices = @transform_3, window_bounds = array<i64: 128, 384>}, {pipeline_mode = #tpu.pipeline_mode<synchronous>, transform_indices = @transform_4, window_bounds = array<i64: 1, 384>}, {pipeline_mode = #tpu.pipeline_mode<synchronous>, transform_indices = @transform_5, window_bounds = array<i64: 128, 128>}, {pipeline_mode = #tpu.pipeline_mode<synchronous>, transform_indices = @transform_6, window_bounds = array<i64: 1, 128>}, {pipeline_mode = #tpu.pipeline_mode<synchronous>, transform_indices = @transform_7, window_bounds = array<i64: 1, 128>}, {pipeline_mode = #tpu.pipeline_mode<synchronous>, transform_indices = @transform_8, window_bounds = array<i64: 1, 128>}, {pipeline_mode = #tpu.pipeline_mode<synchronous>, transform_indices = @transform_9, window_bounds = array<i64: 1, 128>}, {pipeline_mode = #tpu.pipeline_mode<synchronous>, transform_indices = @transform_10, window_bounds = array<i64: 1, 128>}, {transform_indices = @transform_11, window_bounds = array<i64: 1, 8, 128>}]} {
    %c0 = arith.constant 0 : index
    %c0_0 = arith.constant 0 : index
    %c0_1 = arith.constant 0 : index
    %0 = vector.load %arg1[%c0, %c0_0, %c0_1] : memref<1x8x128xbf16, #tpu.memory_space<vmem>>, vector<1x8x128xbf16>
    %1 = vector.shape_cast %0 : vector<1x8x128xbf16> to vector<8x128xbf16>
    %2 = arith.extf %1 : vector<8x128xbf16> to vector<8x128xf32>
    %c0_2 = arith.constant 0 : index
    %c0_3 = arith.constant 0 : index
    %3 = vector.load %arg4[%c0_2, %c0_3] : memref<128x384xbf16, #tpu.memory_space<vmem>>, vector<128x384xbf16>
    %cst = arith.constant dense<0.000000e+00> : vector<8x384xf32>
    %4 = tpu.matmul %1, %3, %cst {dimension_numbers = #tpu.dot_dimension_numbers<[1], [0], [0], [1], [0, 0, 1, 1], [], []>} : vector<8x128xbf16>, vector<128x384xbf16>, vector<8x384xf32> -> vector<8x384xf32>
    %c0_4 = arith.constant 0 : index
    %c0_5 = arith.constant 0 : index
    %5 = vector.load %arg5[%c0_4, %c0_5] : memref<1x384xf32, #tpu.memory_space<vmem>>, vector<1x384xf32>
    %6 = vector.broadcast %5 : vector<1x384xf32> to vector<8x384xf32>
    %7 = arith.addf %4, %6 : vector<8x384xf32>
    %8 = vector.extract_strided_slice %7 {offsets = [0, 0], sizes = [8, 128], strides = [1, 1]} : vector<8x384xf32> to vector<8x128xf32>
    %9 = vector.extract_strided_slice %7 {offsets = [0, 128], sizes = [8, 128], strides = [1, 1]} : vector<8x384xf32> to vector<8x128xf32>
    %10 = vector.extract_strided_slice %7 {offsets = [0, 256], sizes = [8, 128], strides = [1, 1]} : vector<8x384xf32> to vector<8x128xf32>
    %c0_6 = arith.constant 0 : index
    %c0_7 = arith.constant 0 : index
    %c0_8 = arith.constant 0 : index
    %11 = vector.load %arg2[%c0_6, %c0_7, %c0_8] : memref<1x1x8xi32, #tpu.memory_space<vmem>>, vector<1x1x8xi32>
    %12 = vector.shape_cast %11 : vector<1x1x8xi32> to vector<1x8xi32>
    %13 = tpu.iota {dimensions = array<i32: 0>} : vector<8x8xi32>
    %14 = tpu.iota {dimensions = array<i32: 1>} : vector<8x8xi32>
    %15 = arith.cmpi sgt, %14, %13 : vector<8x8xi32>
    %c0_i32 = arith.constant 0 : i32
    %16 = vector.broadcast %c0_i32 : i32 to vector<1x8xi32>
    %17 = arith.cmpi eq, %12, %16 : vector<1x8xi32>
    %18 = vector.broadcast %17 : vector<1x8xi1> to vector<8x8xi1>
    %19 = arith.ori %15, %18 : vector<8x8xi1>
    %cst_9 = arith.constant -1.000000e+09 : f32
    %cst_10 = arith.constant 0.000000e+00 : f32
    %20 = vector.broadcast %cst_9 : f32 to vector<8x8xf32>
    %21 = vector.broadcast %cst_10 : f32 to vector<8x8xf32>
    %22 = arith.select %19, %20, %21 : vector<8x8xi1>, vector<8x8xf32>
    %23 = vector.extract_strided_slice %8 {offsets = [0, 0], sizes = [8, 32], strides = [1, 1]} : vector<8x128xf32> to vector<8x32xf32>
    %24 = arith.truncf %23 : vector<8x32xf32> to vector<8x32xbf16>
    %25 = vector.extract_strided_slice %9 {offsets = [0, 0], sizes = [8, 32], strides = [1, 1]} : vector<8x128xf32> to vector<8x32xf32>
    %26 = arith.truncf %25 : vector<8x32xf32> to vector<8x32xbf16>
    %27 = vector.extract_strided_slice %10 {offsets = [0, 0], sizes = [8, 32], strides = [1, 1]} : vector<8x128xf32> to vector<8x32xf32>
    %28 = arith.truncf %27 : vector<8x32xf32> to vector<8x32xbf16>
    %cst_11 = arith.constant dense<0.000000e+00> : vector<8x8xf32>
    %29 = tpu.matmul %24, %26, %cst_11 {dimension_numbers = #tpu.dot_dimension_numbers<[1], [1], [0], [0], [0, 0, 1, 0], [], []>} : vector<8x32xbf16>, vector<8x32xbf16>, vector<8x8xf32> -> vector<8x8xf32>
    %cst_12 = arith.constant 0.176776692 : f32
    %30 = vector.broadcast %cst_12 : f32 to vector<8x8xf32>
    %31 = arith.mulf %29, %30 : vector<8x8xf32>
    %32 = arith.addf %31, %22 : vector<8x8xf32>
    %cst_13 = arith.constant dense<0xFF800000> : vector<8xf32>
    %33 = vector.multi_reduction <maximumf>, %32, %cst_13 [1] : vector<8x8xf32> to vector<8xf32>
    %34 = vector.shape_cast %33 : vector<8xf32> to vector<8x1xf32>
    %35 = vector.broadcast %34 : vector<8x1xf32> to vector<8x8xf32>
    %36 = arith.subf %32, %35 : vector<8x8xf32>
    %37 = math.exp %36 : vector<8x8xf32>
    %cst_14 = arith.constant dense<0.000000e+00> : vector<8xf32>
    %38 = vector.multi_reduction <add>, %37, %cst_14 [1] : vector<8x8xf32> to vector<8xf32>
    %39 = vector.shape_cast %38 : vector<8xf32> to vector<8x1xf32>
    %40 = tpu.reciprocal %39 {approx = true} : vector<8x1xf32> -> vector<8x1xf32>
    %41 = vector.broadcast %40 : vector<8x1xf32> to vector<8x8xf32>
    %42 = arith.mulf %37, %41 : vector<8x8xf32>
    %43 = arith.truncf %42 : vector<8x8xf32> to vector<8x8xbf16>
    %cst_15 = arith.constant dense<0.000000e+00> : vector<8x32xf32>
    %44 = tpu.matmul %43, %28, %cst_15 {dimension_numbers = #tpu.dot_dimension_numbers<[1], [0], [0], [1], [0, 0, 1, 1], [], []>} : vector<8x8xbf16>, vector<8x32xbf16>, vector<8x32xf32> -> vector<8x32xf32>
    %45 = vector.extract_strided_slice %8 {offsets = [0, 32], sizes = [8, 32], strides = [1, 1]} : vector<8x128xf32> to vector<8x32xf32>
    %46 = arith.truncf %45 : vector<8x32xf32> to vector<8x32xbf16>
    %47 = vector.extract_strided_slice %9 {offsets = [0, 32], sizes = [8, 32], strides = [1, 1]} : vector<8x128xf32> to vector<8x32xf32>
    %48 = arith.truncf %47 : vector<8x32xf32> to vector<8x32xbf16>
    %49 = vector.extract_strided_slice %10 {offsets = [0, 32], sizes = [8, 32], strides = [1, 1]} : vector<8x128xf32> to vector<8x32xf32>
    %50 = arith.truncf %49 : vector<8x32xf32> to vector<8x32xbf16>
    %cst_16 = arith.constant dense<0.000000e+00> : vector<8x8xf32>
    %51 = tpu.matmul %46, %48, %cst_16 {dimension_numbers = #tpu.dot_dimension_numbers<[1], [1], [0], [0], [0, 0, 1, 0], [], []>} : vector<8x32xbf16>, vector<8x32xbf16>, vector<8x8xf32> -> vector<8x8xf32>
    %cst_17 = arith.constant 0.176776692 : f32
    %52 = vector.broadcast %cst_17 : f32 to vector<8x8xf32>
    %53 = arith.mulf %51, %52 : vector<8x8xf32>
    %54 = arith.addf %53, %22 : vector<8x8xf32>
    %cst_18 = arith.constant dense<0xFF800000> : vector<8xf32>
    %55 = vector.multi_reduction <maximumf>, %54, %cst_18 [1] : vector<8x8xf32> to vector<8xf32>
    %56 = vector.shape_cast %55 : vector<8xf32> to vector<8x1xf32>
    %57 = vector.broadcast %56 : vector<8x1xf32> to vector<8x8xf32>
    %58 = arith.subf %54, %57 : vector<8x8xf32>
    %59 = math.exp %58 : vector<8x8xf32>
    %cst_19 = arith.constant dense<0.000000e+00> : vector<8xf32>
    %60 = vector.multi_reduction <add>, %59, %cst_19 [1] : vector<8x8xf32> to vector<8xf32>
    %61 = vector.shape_cast %60 : vector<8xf32> to vector<8x1xf32>
    %62 = tpu.reciprocal %61 {approx = true} : vector<8x1xf32> -> vector<8x1xf32>
    %63 = vector.broadcast %62 : vector<8x1xf32> to vector<8x8xf32>
    %64 = arith.mulf %59, %63 : vector<8x8xf32>
    %65 = arith.truncf %64 : vector<8x8xf32> to vector<8x8xbf16>
    %cst_20 = arith.constant dense<0.000000e+00> : vector<8x32xf32>
    %66 = tpu.matmul %65, %50, %cst_20 {dimension_numbers = #tpu.dot_dimension_numbers<[1], [0], [0], [1], [0, 0, 1, 1], [], []>} : vector<8x8xbf16>, vector<8x32xbf16>, vector<8x32xf32> -> vector<8x32xf32>
    %67 = vector.extract_strided_slice %8 {offsets = [0, 64], sizes = [8, 32], strides = [1, 1]} : vector<8x128xf32> to vector<8x32xf32>
    %68 = arith.truncf %67 : vector<8x32xf32> to vector<8x32xbf16>
    %69 = vector.extract_strided_slice %9 {offsets = [0, 64], sizes = [8, 32], strides = [1, 1]} : vector<8x128xf32> to vector<8x32xf32>
    %70 = arith.truncf %69 : vector<8x32xf32> to vector<8x32xbf16>
    %71 = vector.extract_strided_slice %10 {offsets = [0, 64], sizes = [8, 32], strides = [1, 1]} : vector<8x128xf32> to vector<8x32xf32>
    %72 = arith.truncf %71 : vector<8x32xf32> to vector<8x32xbf16>
    %cst_21 = arith.constant dense<0.000000e+00> : vector<8x8xf32>
    %73 = tpu.matmul %68, %70, %cst_21 {dimension_numbers = #tpu.dot_dimension_numbers<[1], [1], [0], [0], [0, 0, 1, 0], [], []>} : vector<8x32xbf16>, vector<8x32xbf16>, vector<8x8xf32> -> vector<8x8xf32>
    %cst_22 = arith.constant 0.176776692 : f32
    %74 = vector.broadcast %cst_22 : f32 to vector<8x8xf32>
    %75 = arith.mulf %73, %74 : vector<8x8xf32>
    %76 = arith.addf %75, %22 : vector<8x8xf32>
    %cst_23 = arith.constant dense<0xFF800000> : vector<8xf32>
    %77 = vector.multi_reduction <maximumf>, %76, %cst_23 [1] : vector<8x8xf32> to vector<8xf32>
    %78 = vector.shape_cast %77 : vector<8xf32> to vector<8x1xf32>
    %79 = vector.broadcast %78 : vector<8x1xf32> to vector<8x8xf32>
    %80 = arith.subf %76, %79 : vector<8x8xf32>
    %81 = math.exp %80 : vector<8x8xf32>
    %cst_24 = arith.constant dense<0.000000e+00> : vector<8xf32>
    %82 = vector.multi_reduction <add>, %81, %cst_24 [1] : vector<8x8xf32> to vector<8xf32>
    %83 = vector.shape_cast %82 : vector<8xf32> to vector<8x1xf32>
    %84 = tpu.reciprocal %83 {approx = true} : vector<8x1xf32> -> vector<8x1xf32>
    %85 = vector.broadcast %84 : vector<8x1xf32> to vector<8x8xf32>
    %86 = arith.mulf %81, %85 : vector<8x8xf32>
    %87 = arith.truncf %86 : vector<8x8xf32> to vector<8x8xbf16>
    %cst_25 = arith.constant dense<0.000000e+00> : vector<8x32xf32>
    %88 = tpu.matmul %87, %72, %cst_25 {dimension_numbers = #tpu.dot_dimension_numbers<[1], [0], [0], [1], [0, 0, 1, 1], [], []>} : vector<8x8xbf16>, vector<8x32xbf16>, vector<8x32xf32> -> vector<8x32xf32>
    %89 = vector.extract_strided_slice %8 {offsets = [0, 96], sizes = [8, 32], strides = [1, 1]} : vector<8x128xf32> to vector<8x32xf32>
    %90 = arith.truncf %89 : vector<8x32xf32> to vector<8x32xbf16>
    %91 = vector.extract_strided_slice %9 {offsets = [0, 96], sizes = [8, 32], strides = [1, 1]} : vector<8x128xf32> to vector<8x32xf32>
    %92 = arith.truncf %91 : vector<8x32xf32> to vector<8x32xbf16>
    %93 = vector.extract_strided_slice %10 {offsets = [0, 96], sizes = [8, 32], strides = [1, 1]} : vector<8x128xf32> to vector<8x32xf32>
    %94 = arith.truncf %93 : vector<8x32xf32> to vector<8x32xbf16>
    %cst_26 = arith.constant dense<0.000000e+00> : vector<8x8xf32>
    %95 = tpu.matmul %90, %92, %cst_26 {dimension_numbers = #tpu.dot_dimension_numbers<[1], [1], [0], [0], [0, 0, 1, 0], [], []>} : vector<8x32xbf16>, vector<8x32xbf16>, vector<8x8xf32> -> vector<8x8xf32>
    %cst_27 = arith.constant 0.176776692 : f32
    %96 = vector.broadcast %cst_27 : f32 to vector<8x8xf32>
    %97 = arith.mulf %95, %96 : vector<8x8xf32>
    %98 = arith.addf %97, %22 : vector<8x8xf32>
    %cst_28 = arith.constant dense<0xFF800000> : vector<8xf32>
    %99 = vector.multi_reduction <maximumf>, %98, %cst_28 [1] : vector<8x8xf32> to vector<8xf32>
    %100 = vector.shape_cast %99 : vector<8xf32> to vector<8x1xf32>
    %101 = vector.broadcast %100 : vector<8x1xf32> to vector<8x8xf32>
    %102 = arith.subf %98, %101 : vector<8x8xf32>
    %103 = math.exp %102 : vector<8x8xf32>
    %cst_29 = arith.constant dense<0.000000e+00> : vector<8xf32>
    %104 = vector.multi_reduction <add>, %103, %cst_29 [1] : vector<8x8xf32> to vector<8xf32>
    %105 = vector.shape_cast %104 : vector<8xf32> to vector<8x1xf32>
    %106 = tpu.reciprocal %105 {approx = true} : vector<8x1xf32> -> vector<8x1xf32>
    %107 = vector.broadcast %106 : vector<8x1xf32> to vector<8x8xf32>
    %108 = arith.mulf %103, %107 : vector<8x8xf32>
    %109 = arith.truncf %108 : vector<8x8xf32> to vector<8x8xbf16>
    %cst_30 = arith.constant dense<0.000000e+00> : vector<8x32xf32>
    %110 = tpu.matmul %109, %94, %cst_30 {dimension_numbers = #tpu.dot_dimension_numbers<[1], [0], [0], [1], [0, 0, 1, 1], [], []>} : vector<8x8xbf16>, vector<8x32xbf16>, vector<8x32xf32> -> vector<8x32xf32>
    %111 = tpu.concatenate %44, %66, %88, %110 in 1 : vector<8x32xf32>, vector<8x32xf32>, vector<8x32xf32>, vector<8x32xf32> -> vector<8x128xf32>
    %112 = arith.truncf %111 : vector<8x128xf32> to vector<8x128xbf16>
    %c0_31 = arith.constant 0 : index
    %c0_32 = arith.constant 0 : index
    %113 = vector.load %arg6[%c0_31, %c0_32] : memref<128x128xbf16, #tpu.memory_space<vmem>>, vector<128x128xbf16>
    %cst_33 = arith.constant dense<0.000000e+00> : vector<8x128xf32>
    %114 = tpu.matmul %112, %113, %cst_33 {dimension_numbers = #tpu.dot_dimension_numbers<[1], [0], [0], [1], [0, 0, 1, 1], [], []>} : vector<8x128xbf16>, vector<128x128xbf16>, vector<8x128xf32> -> vector<8x128xf32>
    %c0_34 = arith.constant 0 : index
    %c0_35 = arith.constant 0 : index
    %115 = vector.load %arg7[%c0_34, %c0_35] : memref<1x128xf32, #tpu.memory_space<vmem>>, vector<1x128xf32>
    %116 = vector.broadcast %115 : vector<1x128xf32> to vector<8x128xf32>
    %117 = arith.addf %114, %116 : vector<8x128xf32>
    %118 = arith.addf %2, %117 : vector<8x128xf32>
    %c0_36 = arith.constant 0 : index
    %c0_37 = arith.constant 0 : index
    %119 = vector.load %arg8[%c0_36, %c0_37] : memref<1x128xf32, #tpu.memory_space<vmem>>, vector<1x128xf32>
    %c0_38 = arith.constant 0 : index
    %c0_39 = arith.constant 0 : index
    %120 = vector.load %arg9[%c0_38, %c0_39] : memref<1x128xf32, #tpu.memory_space<vmem>>, vector<1x128xf32>
    %cst_40 = arith.constant dense<0.000000e+00> : vector<8xf32>
    %121 = vector.multi_reduction <add>, %118, %cst_40 [1] : vector<8x128xf32> to vector<8xf32>
    %122 = vector.shape_cast %121 : vector<8xf32> to vector<8x1xf32>
    %cst_41 = arith.constant 1.280000e+02 : f32
    %123 = vector.broadcast %cst_41 : f32 to vector<8x1xf32>
    %124 = arith.divf %122, %123 : vector<8x1xf32>
    %125 = vector.broadcast %124 : vector<8x1xf32> to vector<8x128xf32>
    %126 = arith.subf %118, %125 : vector<8x128xf32>
    %127 = arith.mulf %126, %126 : vector<8x128xf32>
    %cst_42 = arith.constant dense<0.000000e+00> : vector<8xf32>
    %128 = vector.multi_reduction <add>, %127, %cst_42 [1] : vector<8x128xf32> to vector<8xf32>
    %129 = vector.shape_cast %128 : vector<8xf32> to vector<8x1xf32>
    %cst_43 = arith.constant 1.280000e+02 : f32
    %130 = vector.broadcast %cst_43 : f32 to vector<8x1xf32>
    %131 = arith.divf %129, %130 : vector<8x1xf32>
    %132 = vector.broadcast %124 : vector<8x1xf32> to vector<8x128xf32>
    %133 = arith.subf %118, %132 : vector<8x128xf32>
    %cst_44 = arith.constant 9.99999974E-6 : f32
    %134 = vector.broadcast %cst_44 : f32 to vector<8x1xf32>
    %135 = arith.addf %131, %134 : vector<8x1xf32>
    %136 = math.rsqrt %135 : vector<8x1xf32>
    %137 = vector.broadcast %136 : vector<8x1xf32> to vector<8x128xf32>
    %138 = arith.mulf %133, %137 : vector<8x128xf32>
    %139 = vector.broadcast %119 : vector<1x128xf32> to vector<8x128xf32>
    %140 = arith.mulf %138, %139 : vector<8x128xf32>
    %141 = vector.broadcast %120 : vector<1x128xf32> to vector<8x128xf32>
    %142 = arith.addf %140, %141 : vector<8x128xf32>
    %143 = arith.addf %2, %142 : vector<8x128xf32>
    %c0_45 = arith.constant 0 : index
    %c0_46 = arith.constant 0 : index
    %144 = vector.load %arg10[%c0_45, %c0_46] : memref<1x128xf32, #tpu.memory_space<vmem>>, vector<1x128xf32>
    %c0_47 = arith.constant 0 : index
    %c0_48 = arith.constant 0 : index
    %145 = vector.load %arg11[%c0_47, %c0_48] : memref<1x128xf32, #tpu.memory_space<vmem>>, vector<1x128xf32>
    %cst_49 = arith.constant dense<0.000000e+00> : vector<8xf32>
    %146 = vector.multi_reduction <add>, %143, %cst_49 [1] : vector<8x128xf32> to vector<8xf32>
    %147 = vector.shape_cast %146 : vector<8xf32> to vector<8x1xf32>
    %cst_50 = arith.constant 1.280000e+02 : f32
    %148 = vector.broadcast %cst_50 : f32 to vector<8x1xf32>
    %149 = arith.divf %147, %148 : vector<8x1xf32>
    %150 = vector.broadcast %149 : vector<8x1xf32> to vector<8x128xf32>
    %151 = arith.subf %143, %150 : vector<8x128xf32>
    %152 = arith.mulf %151, %151 : vector<8x128xf32>
    %cst_51 = arith.constant dense<0.000000e+00> : vector<8xf32>
    %153 = vector.multi_reduction <add>, %152, %cst_51 [1] : vector<8x128xf32> to vector<8xf32>
    %154 = vector.shape_cast %153 : vector<8xf32> to vector<8x1xf32>
    %cst_52 = arith.constant 1.280000e+02 : f32
    %155 = vector.broadcast %cst_52 : f32 to vector<8x1xf32>
    %156 = arith.divf %154, %155 : vector<8x1xf32>
    %157 = vector.broadcast %149 : vector<8x1xf32> to vector<8x128xf32>
    %158 = arith.subf %143, %157 : vector<8x128xf32>
    %cst_53 = arith.constant 9.99999974E-6 : f32
    %159 = vector.broadcast %cst_53 : f32 to vector<8x1xf32>
    %160 = arith.addf %156, %159 : vector<8x1xf32>
    %161 = math.rsqrt %160 : vector<8x1xf32>
    %162 = vector.broadcast %161 : vector<8x1xf32> to vector<8x128xf32>
    %163 = arith.mulf %158, %162 : vector<8x128xf32>
    %164 = vector.broadcast %144 : vector<1x128xf32> to vector<8x128xf32>
    %165 = arith.mulf %163, %164 : vector<8x128xf32>
    %166 = vector.broadcast %145 : vector<1x128xf32> to vector<8x128xf32>
    %167 = arith.addf %165, %166 : vector<8x128xf32>
    %c0_54 = arith.constant 0 : index
    %c0_55 = arith.constant 0 : index
    %c0_56 = arith.constant 0 : index
    %168 = vector.load %arg3[%c0_54, %c0_55, %c0_56] : memref<1x8x1xf32, #tpu.memory_space<vmem>>, vector<1x8x1xf32>
    %169 = vector.shape_cast %168 : vector<1x8x1xf32> to vector<8x1xf32>
    %170 = vector.broadcast %169 : vector<8x1xf32> to vector<8x128xf32>
    %171 = arith.mulf %167, %170 : vector<8x128xf32>
    %172 = arith.truncf %171 : vector<8x128xf32> to vector<8x128xbf16>
    %c0_57 = arith.constant 0 : index
    %c0_58 = arith.constant 0 : index
    %c0_59 = arith.constant 0 : index
    %173 = vector.load %arg12[%c0_57, %c0_58, %c0_59] : memref<1x8x128xbf16, #tpu.memory_space<vmem>>, vector<1x8x128xbf16>
    %174 = vector.shape_cast %173 : vector<1x8x128xbf16> to vector<8x128xbf16>
    %175 = vector.shape_cast %172 : vector<8x128xbf16> to vector<1x8x128xbf16>
    tpu.vector_store %arg12[%c0_57, %c0_58, %c0_59], %175 {strides = array<i32>} : memref<1x8x128xbf16, #tpu.memory_space<vmem>>, vector<1x8x128xbf16>,
    return
  }
  func.func @transform_0(%arg0: i32) -> (i32, i32, i32) {
    %c0_i32 = arith.constant 0 : i32
    %c0_i32_0 = arith.constant 0 : i32
    %c0_i32_1 = arith.constant 0 : i32
    return %arg0, %c0_i32, %c0_i32_0 : i32, i32, i32
  }
  func.func @transform_1(%arg0: i32) -> (i32, i32, i32) {
    %c0_i32 = arith.constant 0 : i32
    %c0_i32_0 = arith.constant 0 : i32
    %c0_i32_1 = arith.constant 0 : i32
    return %arg0, %c0_i32, %c0_i32_0 : i32, i32, i32
  }
  func.func @transform_2(%arg0: i32) -> (i32, i32, i32) {
    %c0_i32 = arith.constant 0 : i32
    %c0_i32_0 = arith.constant 0 : i32
    %c0_i32_1 = arith.constant 0 : i32
    return %arg0, %c0_i32, %c0_i32_0 : i32, i32, i32
  }
  func.func @transform_3(%arg0: i32) -> (i32, i32) {
    %c0_i32 = arith.constant 0 : i32
    %c0_i32_0 = arith.constant 0 : i32
    %c0_i32_1 = arith.constant 0 : i32
    return %c0_i32, %c0_i32_0 : i32, i32
  }
  func.func @transform_4(%arg0: i32) -> (i32, i32) {
    %c0_i32 = arith.constant 0 : i32
    %c0_i32_0 = arith.constant 0 : i32
    %c0_i32_1 = arith.constant 0 : i32
    return %c0_i32, %c0_i32_0 : i32, i32
  }
  func.func @transform_5(%arg0: i32) -> (i32, i32) {
    %c0_i32 = arith.constant 0 : i32
    %c0_i32_0 = arith.constant 0 : i32
    %c0_i32_1 = arith.constant 0 : i32
    return %c0_i32, %c0_i32_0 : i32, i32
  }
  func.func @transform_6(%arg0: i32) -> (i32, i32) {
    %c0_i32 = arith.constant 0 : i32
    %c0_i32_0 = arith.constant 0 : i32
    %c0_i32_1 = arith.constant 0 : i32
    return %c0_i32, %c0_i32_0 : i32, i32
  }
  func.func @transform_7(%arg0: i32) -> (i32, i32) {
    %c0_i32 = arith.constant 0 : i32
    %c0_i32_0 = arith.constant 0 : i32
    %c0_i32_1 = arith.constant 0 : i32
    return %c0_i32, %c0_i32_0 : i32, i32
  }
  func.func @transform_8(%arg0: i32) -> (i32, i32) {
    %c0_i32 = arith.constant 0 : i32
    %c0_i32_0 = arith.constant 0 : i32
    %c0_i32_1 = arith.constant 0 : i32
    return %c0_i32, %c0_i32_0 : i32, i32
  }
  func.func @transform_9(%arg0: i32) -> (i32, i32) {
    %c0_i32 = arith.constant 0 : i32
    %c0_i32_0 = arith.constant 0 : i32
    %c0_i32_1 = arith.constant 0 : i32
    return %c0_i32, %c0_i32_0 : i32, i32
  }
  func.func @transform_10(%arg0: i32) -> (i32, i32) {
    %c0_i32 = arith.constant 0 : i32
    %c0_i32_0 = arith.constant 0 : i32
    %c0_i32_1 = arith.constant 0 : i32
    return %c0_i32, %c0_i32_0 : i32, i32
  }
  func.func @transform_11(%arg0: i32) -> (i32, i32, i32) {
    %c0_i32 = arith.constant 0 : i32
    %c0_i32_0 = arith.constant 0 : i32
    %c0_i32_1 = arith.constant 0 : i32
    return %arg0, %c0_i32, %c0_i32_0 : i32, i32, i32
  }
}

</mosaic_0001>

<bundles_post_ra>
// kernel: transformer_decoder_forward.13
= control target key start
LH: loop header
LB: loop body
LE: loop exit
PB: predicated region body
PF: predicated region fallthrough
CT: control target
= control target key end

     0   :  { %7 = vsyncpa [#allocation3], 0  ;;  %s703_s0 = inlined_call_operand.vmem [shape: bf16[2,8,128], index: 0, kind: input, shape index: {}]   ;;  %s704_s1 = inlined_call_operand.vmem [shape: bf16[128,128], index: 1, kind: input, shape index: {}]   ;;  %s705_s2 = inlined_call_operand.hbm [shape: f32[2,8,128], index: 2, kind: output, shape index: {}]  }
   0x1   :  { %9 = vsyncpa [#allocation3 + $0x1], 0  ;;  %s580_s9 = smov 0   ;;  %s582_s10 = smov 0  }
   0x2   :  { %s584_s11 = smov 0   ;;  %s586_s12 = smov 0  }
   0x3   :  { %s588_s13 = smov 0   ;;  %s590_s14 = smov 0  }
   0x4 LB: > { %s367_s15 = sadd.s32 4294967295, %s560_s14   ;;  %s368_s16 = sadd.s32 4294967294, %s560_s14   ;;  %s560_s14 = sphi %s590_s14, %s15_s14   ;;  %s556_s13 = sphi %s588_s13, %s712_s13   ;;  %s552_s12 = sphi %s586_s12, %s711_s12   ;;  %s548_s11 = sphi %s584_s11, %s710_s11   ;;  %s544_s10 = sphi %s582_s10, %s709_s10   ;;  %s540_s9 = sphi %s580_s9, %s708_s9  }
   0x5   : > { %s27_s17 = sadd.s32 1, %s556_s13  ;;  %s85_s18 = sadd.s32 1, %s548_s11 }
   0x6   : > { %p29_p0 = scmp.ge.s32.totalorder %s27_s17, 2  ;;  %p95_p1 = scmp.ne.s32.totalorder %s548_s11, %s544_s10 }
   0x7   : > { %p96_p2 = scmp.eq.s32.totalorder %s367_s15, 1  ;;  %p101_p3 = scmp.ne.s32.totalorder %s544_s10, %s540_s9 }
   0x8   : > { %s714_s17 = smov (%p29_p0, %s27_s17), 0  ;;  %p102_p5 = scmp.eq.s32.totalorder %s368_s16, 1 }
   0x9   : > { %p620_p4 = por %p96_p2, %p95_p1  ;;  %s80_s20 = ssub.s32 %s556_s13, %s714_s17 }
   0xa   : > { %p371_p6 = scmp.ge.s32.totalorder %s560_s14, 1  ;;  %p83_p7 = scmp.eq.s32.totalorder %s80_s20, 0 }
   0xb   : > { %p627_p8 = por %p102_p5, %p101_p3  ;;  %p133_p9 = scmp.lt.s32.totalorder %s560_s14, 3 }
   0xc   : > { %s633_s22 = scalar_select %p83_p7, %s548_s11, %s85_s18  }
   0xd   : > { %p134_p10 = pnand %p371_p6, %p133_p9 }
   0xe   : > { %p157_p11 = scmp.lt.s32.totalorder (!%p134_p10), %s552_s12, 1  ;;  %s154_s26 = sand.u32 (!%p134_p10), 1, %s544_s10  }
   0xf   : > { %137 = sbr.rel (%p134_p10) target bundleno = 571 (0x23b), region = 28  ;;  %s372_s27 = sshll.u32 (!%p134_p10), %s154_s26, 3 }
  0x10   : > { %s383_s28 = sshll.u32 (!%p134_p10), %s552_s12, 7  ;;  %s156_s29 = scalar_lea.vmem (!%p134_p10), [#allocation2], %s372_s27 }
  0x11   : > { %s296_s30 = sshll.u32 (!%p134_p10), %s156_s29, 4  ;;  %s294_s5 = scalar_lea.hbm (!%p134_p10), %s705_s2, %s383_s28  ;;  %s297_s30 = int_to_ptr.vmem [resolvable:$true] %s296_s30 }
  0x12   : > { %s282_s6 = scalar_lea.sflag (!%p134_p10), [#allocation3], %s154_s26  ;;  %s564_s8 = smov (!%p134_p10), [#allocation2]  }
  0x13   : > { %s488_s15 = sshll.u32 (!%p134_p10), %s564_s8, 4  ;;  %s489_s15 = int_to_ptr.vmem [resolvable:$false] %s488_s15 }
  0x14   : > { %v472_v0 = vld [vmem:[%s704_s1 + $0x38] sm:$0xff]   ;;  %v562_v1 = vmov 0.0   ;;  %v473_v2 = vld [vmem:[%s704_s1 + $0x30] sm:$0xff]   ;;  %vm563_vm0 = vmmov 0   ;;  %v474_v3 = vld [vmem:[%s704_s1 + $0x28] sm:$0xff]   ;;  %s158_s7 = scalar_select %p157_p11, %s552_s12, 1 }
  0x15   : > { %395 = vmatprep.subr.bf16.mxu0 %v562_v1  ;;  %411 = vmatprep.mubr.msk.bf16.mxu0 %vm563_vm0, %v562_v1  ;;  %v475_v4 = vld [vmem:[%s704_s1 + $0x20] sm:$0xff]   ;;  %v476_v5 = vld [vmem:[%s704_s1 + $0x18] sm:$0xff]   ;;  %v477_v6 = vld [vmem:[%s704_s1 + $0x10] sm:$0xff]   ;;  %s490_s12 = scalar_lea.vmem %s489_s15, 256  ;;  %p491_p1 = scmp.lt.s32.totalorder %s297_s30, %s489_s15 }
  0x16   : > { %396 = vmatpush3.bf16.msra.mxu0 %v472_v0  ;;  %v478_v7 = vld [vmem:[%s704_s1 + $0x8] sm:$0xff]   ;;  %s373_s16 = sshll.u32 %s158_s7, 2  ;;  %v479_v8 = vld [vmem:[%s704_s1] sm:$0xff]   ;;  %s484_s7 = scalar_lea.vmem %s297_s30, 128 }
  0x17   : > { %397 = vmatprep.subr.bf16.mxu0 %v562_v1  ;;  %s163_s25 = scalar_lea.vmem %s703_s0, %s373_s16  ;;  %p485_p12 = scmp.ne.s32.totalorder %s297_s30, %s484_s7 }
  0x18   : > { %v165_v9 = vld [vmem:[%s163_s25] sm:$0xf]  ;;  %p492_p2 = scmp.lt.s32.totalorder %s490_s12, %s484_s7 }
  0x19   : > { %p486_p13 = pnand %p485_p12, %p620_p4 }
  0x1a   : > { %398 = vmatpush3.bf16.msra.mxu0 %v473_v2  ;;  %p493_p3 = por %p492_p2, %p491_p1 }
  0x1b   : > { %399 = vmatprep.subr.bf16.mxu0 %v562_v1  ;;  %p487_p0 = pneg %p486_p13 }
  0x1d   : > { %p494_p5 = pnand %p493_p3, %p487_p0 }
  0x1e   : > { %400 = vmatpush3.bf16.msra.mxu0 %v474_v3 }
  0x1f   : > { %401 = vmatprep.subr.bf16.mxu0 %v562_v1 }
  0x22   : > { %402 = vmatpush3.bf16.msra.mxu0 %v475_v4 }
  0x23   : > { %403 = vmatprep.subr.bf16.mxu0 %v562_v1 }
  0x26   : > { %404 = vmatpush3.bf16.msra.mxu0 %v476_v5 }
  0x27   : > { %405 = vmatprep.subr.bf16.mxu0 %v562_v1 }
  0x2a   : > { %406 = vmatpush3.bf16.msra.mxu0 %v477_v6 }
  0x2b   : > { %407 = vmatprep.subr.bf16.mxu0 %v562_v1 }
  0x2e   : > { %408 = vmatpush3.bf16.msra.mxu0 %v478_v7 }
  0x2f   : > { %409 = vmatprep.subr.bf16.mxu0 %v562_v1 }
  0x32   : > { %410 = vmatpush3.bf16.msra.mxu0 %v479_v8 }
  0x35   : > { %412 = vmatmul.mubr.bf16.vlgmr.msra.gmra.mxu0 %v165_v9 }
  0xf5   : > { %v264_v10 = vpop.f32.mrf.mxu0 }
  0xf6   : > { %270 = vmax.xlane.f32.xlu0 %v264_v10 }
  0xf7   : > { %v413_v11 = vpop.f32.mrf.mxu0 }
  0xf9   : > { %v267_v12 = vpop.f32.mrf.mxu0 }
  0xfb   : > { %v414_v13 = vpop.f32.mrf.mxu0 }
 0x17f   : > { %v271_v14 = vpop.xlane.xlu0 %270 }
 0x180   : > { %v272_v15 = vsub.f32 %v264_v10, %v271_v14 }
 0x182   : > { %v273_v16 = vmul.f32 1.442695, %v272_v15 }
 0x184   : > { %480 = vpow2.f32 %v273_v16 }
 0x191   : > { %v481_v17 = vpop.eup %480 }
 0x192   : > { %275 = vadd.xlane.f32.xlu0 %v481_v17 }
 0x21b   : > { %v276_v18 = vpop.xlane.xlu0 %275 }
 0x21c   : > { %482 = vlog2.f32 %v276_v18 }
 0x229   : > { %v483_v19 = vpop.eup %482 }
 0x22a   : > { %v278_v20 = vmul.f32 0.6931472, %v483_v19 }
 0x22c   : > { %v279_v21 = vsub.f32 %v272_v15, %v278_v20 }
 0x22e   : > { %280 = vst [vmem:[%s156_s29] sm:$0xff] %v279_v21 }
 0x22f   : > { %497 = shalt.err (!%p494_p5)
}
 0x230   : > { %s498_s16 = scalar_lea.hbm %s294_s5, 128  ;;  %s502_s23 = scalar_lea.hbm %s705_s2, 256 }
 0x231   : > { %p499_p6 = scmp.ne.s32.totalorder %s294_s5, %s498_s16  ;;  %p503_p10 = scmp.lt.s32.totalorder %s294_s5, %s705_s2 }
 0x232   : > { %p504_p11 = scmp.lt.s32.totalorder %s502_s23, %s498_s16 }
 0x233   : > { %p500_p7 = pnand %p499_p6, %p620_p4 }
 0x234   : > { %p505_p12 = por %p504_p11, %p503_p10 }
 0x235   : > { %p501_p9 = pneg %p500_p7 }
 0x237   : > { %p506_p13 = pnand %p505_p12, %p501_p9 }
 0x239   : > { %509 = shalt.err (!%p506_p13)
}
 0x23a   : > { %415 = dma.vmem_to_hbm [thread:$0]  (%p620_p4), %s297_s30, 128, %s294_s5, %s282_s6  }
 0x23b PF: > { %p421_p0 = scmp.ge.s32.totalorder %s560_s14, 2  ;;  %s308_s26 = sand.u32 1, %s540_s9  }
 0x23c   : > { %s309_s27 = scalar_lea.sflag [#allocation3], %s308_s26 }
 0x23d   : > { %p418_p1 = pnand %p421_p0, %p627_p8 }
 0x23f   : > { %p419_p2 = pneg %p418_p1 }
 0x241   : > { %535 = dma.done.wait (%p419_p2), %s309_s27, 128  }
 0x242   : > { %537 = vsyncadd (%p419_p2), %s309_s27, 4294967168  ;;  %s15_s14 = sadd.s32 1, %s560_s14   ;;  %s708_s9 = smov %s544_s10 }
 0x243   : > { %p12_p3 = scmp.ge.s32.totalorder %s15_s14, 4   ;;  %s709_s10 = smov %s548_s11 }
 0x244   : > { %s710_s11 = smov %s633_s22  ;;  %s711_s12 = smov %s556_s13 }
 0x245   : > { %s712_s13 = smov %s714_s17  ;;  %14 = sbr.rel (!%p12_p3) target bundleno = 4 (0x4), region = 63 }
 0x24a   :  { %314 = vsyncpa [#allocation3], 1 }
 0x24b   :  { %316 = vsyncpa [#allocation3 + $0x1], 1 }

// kernel: transformer_decoder_forward.9
= control target key start
LH: loop header
LB: loop body
LE: loop exit
PB: predicated region body
PF: predicated region fallthrough
CT: control target
= control target key end

     0   :  { %s1024_s27 = smov 0   ;;  %s1026_s28 = smov 0   ;;  %s1180_s0 = inlined_call_operand.vmem [shape: bf16[2,8,128], index: 0, kind: input, shape index: {}]   ;;  %s1181_s1 = inlined_call_operand.vmem [shape: f32[2,8,1], index: 1, kind: input, shape index: {}]   ;;  %s1182_s2 = inlined_call_operand.vmem [shape: bf16[128,256], index: 2, kind: input, shape index: {}]   ;;  %s1183_s3 = inlined_call_operand.vmem [shape: f32[1,256], index: 3, kind: input, shape index: {}]   ;;  %s1184_s4 = inlined_call_operand.vmem [shape: bf16[256,128], index: 4, kind: input, shape index: {}]   ;;  %s1185_s5 = inlined_call_operand.vmem [shape: f32[1,128], index: 5, kind: input, shape index: {}]   ;;  %s1186_s6 = inlined_call_operand.vmem [shape: f32[1,128], index: 6, kind: input, shape index: {}]   ;;  %s1187_s7 = inlined_call_operand.vmem [shape: f32[1,128], index: 7, kind: input, shape index: {}]   ;;  %s1188_s8 = inlined_call_operand.vmem [shape: bf16[2,8,128], index: 8, kind: output, shape index: {}]  }
   0x1   :  { %s1028_s29 = smov 0  }
   0x2 LB: > { %s30_s30 = sadd.s32 1, %s972_s28  ;;  %p822_p0 = scmp.ge.s32.totalorder %s976_s29, 1  ;;  %s976_s29 = sphi %s1028_s29, %s18_s29   ;;  %s972_s28 = sphi %s1026_s28, %s1190_s28   ;;  %s968_s27 = sphi %s1024_s27, %s1189_s27  }
   0x3   : > { %p32_p1 = scmp.ge.s32.totalorder %s30_s30, 2  ;;  %p294_p2 = scmp.lt.s32.totalorder %s976_s29, 3 }
   0x5   : > { %s1192_s30 = smov (%p32_p1, %s30_s30), 0  ;;  %p295_p3 = pnand %p822_p0, %p294_p2 }
   0x6   : > { %p339_p4 = scmp.lt.s32.totalorder (!%p295_p3), %s968_s27, 1 }
   0x7   : > { %298 = sbr.rel (%p295_p3) target bundleno = 760 (0x2f8), region = 52 }
   0xc   : > { %v912_v0 = vld [vmem:[%s1182_s2 + $0x74] ss:$8 sps:$4 sm:$0xff]   ;;  %v914_v1 = vld [vmem:[%s1182_s2 + $0x70] ss:$8 sps:$4 sm:$0xff]   ;;  %v978_v2 = vmov 0   ;;  %v940_v15 = vld [vmem:[%s1184_s4 + $0x68] sm:$0xff]   ;;  %v381_v34 = vlaneseq }
   0xd   : > { %503 = vmatprep.mubr.bf16.mxu0 %v978_v2  ;;  %910 = vset.pattern.permute.xlu1 %v978_v2  ;;  %v915_v3 = vld [vmem:[%s1182_s2 + $0x64] ss:$8 sps:$4 sm:$0xff]   ;;  %v917_v4 = vld [vmem:[%s1182_s2 + $0x60] ss:$8 sps:$4 sm:$0xff]   ;;  %v918_v5 = vld [vmem:[%s1182_s2 + $0x54] ss:$8 sps:$4 sm:$0xff]  }
   0xe   : > { %471 = vmatprep.subr.bf16.mxu0 %v912_v0  ;;  %911 = vset.pattern.permute.xlu0 %v978_v2  ;;  %v920_v6 = vld [vmem:[%s1182_s2 + $0x50] ss:$8 sps:$4 sm:$0xff]   ;;  %v921_v7 = vld [vmem:[%s1182_s2 + $0x44] ss:$8 sps:$4 sm:$0xff]   ;;  %v923_v8 = vld [vmem:[%s1182_s2 + $0x40] ss:$8 sps:$4 sm:$0xff]  }
   0xf   : > { %472 = vmatpush1.bf16.msra.mxu0 %v914_v1  ;;  %v924_v9 = vld [vmem:[%s1182_s2 + $0x34] ss:$8 sps:$4 sm:$0xff]   ;;  %v926_v12 = vld [vmem:[%s1182_s2 + $0x30] ss:$8 sps:$4 sm:$0xff]   ;;  %v927_v16 = vld [vmem:[%s1182_s2 + $0x24] ss:$8 sps:$4 sm:$0xff]  }
  0x10   : > { %473 = vmatprep.subr.bf16.mxu0 %v915_v3  ;;  %v936_v10 = vld [vmem:[%s1184_s4 + $0x78] sm:$0xff]   ;;  %v938_v13 = vld [vmem:[%s1184_s4 + $0x70] sm:$0xff]   ;;  %v929_v17 = vld [vmem:[%s1182_s2 + $0x20] ss:$8 sps:$4 sm:$0xff]   ;;  %s1194_s27 = smov (!%p339_p4, %s968_s27), 1  ;;  %v382_v35 = vshrl.u32 %v381_v34, 7 }
  0x11   : > { %v937_v11 = vld [vmem:[%s1184_s4 + $0x38] sm:$0xff]   ;;  %863 = vmatprep.subr.bf16.mxu1 %v936_v10  ;;  %v939_v14 = vld [vmem:[%s1184_s4 + $0x30] sm:$0xff]   ;;  %v941_v18 = vld [vmem:[%s1184_s4 + $0x28] sm:$0xff]   ;;  %s823_s19 = sshll.u32 %s1194_s27, 2  ;;  %s824_s10 = sshll.u32 %s1194_s27, 3 }
  0x12   : > { %864 = vmatpush3.bf16.msra.mxu1 %v937_v11  ;;  %v942_v19 = vld [vmem:[%s1184_s4 + $0x60] sm:$0xff]   ;;  %v930_v20 = vld [vmem:[%s1182_s2 + $0x14] ss:$8 sps:$4 sm:$0xff]   ;;  %v932_v21 = vld [vmem:[%s1182_s2 + $0x10] ss:$8 sps:$4 sm:$0xff]   ;;  %s345_s12 = scalar_lea.vmem %s1180_s0, %s823_s19  ;;  %v383_v36 = vsub.s32 0, %v382_v35  ;;  %s352_s13 = scalar_lea.vmem %s1181_s1, %s824_s10 }
  0x13   : > { %474 = vmatpush1.bf16.msra.mxu0 %v917_v4  ;;  %865 = vmatprep.subr.bf16.mxu1 %v938_v13  ;;  %v933_v22 = vld [vmem:[%s1182_s2 + $0x4] ss:$8 sps:$4 sm:$0xff]   ;;  %v944_v24 = vld [vmem:[%s1184_s4 + $0x58] sm:$0xff]   ;;  %v935_v26 = vld [vmem:[%s1182_s2] ss:$8 sps:$4 sm:$0xff]   ;;  %v387_v38 = vsub.s32 1, %v382_v35  ;;  %s359_s21 = scalar_lea.vmem %s1188_s8, %s823_s19 }
  0x14   : > { %475 = vmatprep.subr.bf16.mxu0 %v918_v5  ;;  %v943_v23 = vld [vmem:[%s1184_s4 + $0x20] sm:$0xff]   ;;  %v945_v25 = vld [vmem:[%s1184_s4 + $0x18] sm:$0xff]   ;;  %v946_v27 = vld [vmem:[%s1184_s4 + $0x50] sm:$0xff]  }
  0x15   : > { %v947_v28 = vld [vmem:[%s1184_s4 + $0x10] sm:$0xff]   ;;  %v361_v29 = vld [vmem:[%s345_s12] sm:$0xf]  ;;  %v948_v30 = vld [vmem:[%s1184_s4 + $0x48] sm:$0xff]  }
  0x16   : > { %866 = vmatpush3.bf16.msra.mxu1 %v939_v14  ;;  %v949_v31 = vld [vmem:[%s1184_s4 + $0x8] sm:$0xff]   ;;  %v950_v32 = vld [vmem:[%s1184_s4 + $0x40] sm:$0xff]   ;;  %v362_v54 = vunpack.c.l.bf16 %v361_v29 }
  0x17   : > { %476 = vmatpush1.bf16.msra.mxu0 %v920_v6  ;;  %867 = vmatprep.subr.bf16.mxu1 %v940_v15  ;;  %v951_v33 = vld [vmem:[%s1184_s4] sm:$0xff]  }
  0x18   : > { %477 = vmatprep.subr.bf16.mxu0 %v921_v7  ;;  %v379_v37 = vld [vmem:[%s1183_s3] sm:$0x3] }
  0x19   : > { %v384_v39 = vrot.slane %v379_v37, %v383_v36  ;;  %v388_v40 = vrot.slane %v379_v37, %v387_v38  ;;  %v842_v52 = vld [vmem:[%s1185_s5] ss:$0 sm:$0xff] }
  0x1a   : > { %868 = vmatpush3.bf16.msra.mxu1 %v941_v18  ;;  %v720_v60 = vld [vmem:[%s352_s13] sm:$0xff] }
  0x1b   : > { %478 = vmatpush1.bf16.msra.mxu0 %v923_v8  ;;  %869 = vmatprep.subr.bf16.mxu1 %v942_v19  ;;  %v859_v5 = vld [vmem:[%s1186_s6] ss:$0 sm:$0xff] }
  0x1c   : > { %479 = vmatprep.subr.bf16.mxu0 %v924_v9  ;;  %723 = vperm.xlu1 %910, %v720_v60   ;;  %v860_v7 = vld [vmem:[%s1187_s7] ss:$0 sm:$0xff] }
  0x1e   : > { %870 = vmatpush3.bf16.msra.mxu1 %v943_v23 }
  0x1f   : > { %480 = vmatpush1.bf16.msra.mxu0 %v926_v12  ;;  %871 = vmatprep.subr.bf16.mxu1 %v944_v24 }
  0x20   : > { %481 = vmatprep.subr.bf16.mxu0 %v927_v16 }
  0x22   : > { %872 = vmatpush3.bf16.msra.mxu1 %v945_v25 }
  0x23   : > { %482 = vmatpush1.bf16.msra.mxu0 %v929_v17  ;;  %873 = vmatprep.subr.bf16.mxu1 %v946_v27 }
  0x24   : > { %483 = vmatprep.subr.bf16.mxu0 %v930_v20 }
  0x26   : > { %874 = vmatpush3.bf16.msra.mxu1 %v947_v28 }
  0x27   : > { %484 = vmatpush1.bf16.msra.mxu0 %v932_v21  ;;  %875 = vmatprep.subr.bf16.mxu1 %v948_v30 }
  0x28   : > { %485 = vmatprep.subr.bf16.mxu0 %v933_v22 }
  0x2a   : > { %876 = vmatpush3.bf16.msra.mxu1 %v949_v31 }
  0x2b   : > { %486 = vmatpush1.bf16.msra.mxu0 %v935_v26  ;;  %877 = vmatprep.subr.bf16.mxu1 %v950_v32 }
  0x2e   : > { %504 = vmatmul.mubr.bf16.vlgmr.msra.gmra.mxu0 %v361_v29  ;;  %878 = vmatpush3.bf16.msra.mxu1 %v951_v33 }
  0x97   : > { %v724_v9 = vpop.permute.xlu1 %723 }
  0xee   : > { %v505_v41 = vpop.f32.mrf.mxu0 }
  0xef   : > { %v506_v42 = vadd.f32 %v505_v41, %v384_v39 }
  0xf0   : > { %v507_v43 = vpop.f32.mrf.mxu0 }
  0xf1   : > { %v508_v44 = vadd.f32 %v507_v43, %v388_v40  ;;  %v512_v45 = vmax.f32 %v506_v42, 0.0 }
  0xf2   : > { %v509_v46 = vpop.f32.mrf.mxu0 }
  0xf3   : > { %v513_v47 = vmax.f32 %v508_v44, 0.0  ;;  %v514_v50 = vpack.c.bf16 %v512_v45, %v512_v45 }
  0xf4   : > { %v510_v48 = vpop.f32.mrf.mxu0 }
  0xf5   : > { %v515_v49 = vpack.c.bf16 %v513_v47, %v513_v47 }
  0xf7   : > { %683 = vmatprep.mubr.bf16.mxu1 %v515_v49 }
  0xf8   : > { %684 = vmatmul.mubr.bf16.vlgmr.msra.gmra.mxu1 %v514_v50 }
 0x1b8   : > { %v879_v51 = vpop.f32.mrf.mxu1 }
 0x1ba   : > { %v880_v53 = vpop.f32.mrf.mxu1 }
 0x1bb   : > { %v881_v55 = vadd.f32 %v880_v53, %v879_v51 }
 0x1bc   : > { %v882_v56 = vpop.f32.mrf.mxu1 }
 0x1bd   : > { %v686_v57 = vadd.f32 %v881_v55, %v842_v52 }
 0x1be   : > { %v883_v58 = vpop.f32.mrf.mxu1 }
 0x1bf   : > { %v691_v59 = vadd.f32 %v686_v57, %v362_v54 }
 0x1c1   : > { %694 = vadd.xlane.f32.xlu0 %v691_v59 }
 0x24a   : > { %v695_v61 = vpop.xlane.xlu0 %694 }
 0x24b   : > { %v697_v62 = vmul.f32 0.0078125, %v695_v61 }
 0x24d   : > { %v698_v63 = vsub.f32 %v691_v59, %v697_v62 }
 0x24f   : > { %v699_v0 = vmul.f32 %v698_v63, %v698_v63 }
 0x251   : > { %700 = vadd.xlane.f32.xlu0 %v699_v0 }
 0x2da   : > { %v701_v1 = vpop.xlane.xlu0 %700 }
 0x2db   : > { %v702_v2 = vmul.f32 0.0078125, %v701_v1 }
 0x2dd   : > { %v703_v3 = vadd.f32 1e-05, %v702_v2 }
 0x2df   : > { %952 = vrsqrt.f32 %v703_v3 }
 0x2ec   : > { %v953_v4 = vpop.eup %952 }
 0x2ed   : > { %v705_v6 = vmul.f32 %v953_v4, %v698_v63 }
 0x2ef   : > { %v712_v8 = vmul.f32 %v859_v5, %v705_v6 }
 0x2f1   : > { %v719_v10 = vadd.f32 %v860_v7, %v712_v8 }
 0x2f3   : > { %v726_v11 = vmul.f32 %v724_v9, %v719_v10 }
 0x2f5   : > { %v727_v12 = vpack.c.bf16 %v726_v11, %v726_v11 }
 0x2f7   : > { %728 = vst [vmem:[%s359_s21] sm:$0xf] %v727_v12 }
 0x2f8 PF: > { %s18_s29 = sadd.s32 1, %s976_s29   ;;  %s1189_s27 = smov %s972_s28 }
 0x2f9   : > { %p15_p5 = scmp.ge.s32.totalorder %s18_s29, 4   ;;  %s1190_s28 = smov %s1192_s30 }
 0x2fb   :  { %17 = sbr.rel (!%p15_p5) target bundleno = 2 (0x2), region = 85 }

// kernel: transformer_decoder_forward.8
= control target key start
LH: loop header
LB: loop body
LE: loop exit
PB: predicated region body
PF: predicated region fallthrough
CT: control target
= control target key end

     0   :  { %s1963_s29 = smov 0   ;;  %s1965_s30 = smov 0   ;;  %s2236_s0 = inlined_call_operand.vmem [shape: bf16[2,8,128], index: 0, kind: input, shape index: {}]   ;;  %s2237_s1 = inlined_call_operand.vmem [shape: bf16[2,16,128], index: 1, kind: input, shape index: {}]   ;;  %s2238_s2 = inlined_call_operand.vmem [shape: s32[2,1,16], index: 2, kind: input, shape index: {}]   ;;  %s2239_s3 = inlined_call_operand.vmem [shape: f32[2,8,1], index: 3, kind: input, shape index: {}]   ;;  %s2240_s4 = inlined_call_operand.vmem [shape: bf16[128,128], index: 4, kind: input, shape index: {}]   ;;  %s2241_s5 = inlined_call_operand.vmem [shape: f32[1,128], index: 5, kind: input, shape index: {}]   ;;  %s2242_s6 = inlined_call_operand.vmem [shape: bf16[128,256], index: 6, kind: input, shape index: {}]   ;;  %s2243_s7 = inlined_call_operand.vmem [shape: f32[1,256], index: 7, kind: input, shape index: {}]   ;;  %s2244_s8 = inlined_call_operand.vmem [shape: bf16[128,128], index: 8, kind: input, shape index: {}]   ;;  %s2245_s9 = inlined_call_operand.vmem [shape: f32[1,128], index: 9, kind: input, shape index: {}]   ;;  %s2246_s10 = inlined_call_operand.vmem [shape: f32[1,128], index: 10, kind: input, shape index: {}]   ;;  %s2247_s11 = inlined_call_operand.vmem [shape: f32[1,128], index: 11, kind: input, shape index: {}]   ;;  %s2248_s12 = inlined_call_operand.vmem [shape: f32[1,128], index: 12, kind: input, shape index: {}]   ;;  %s2249_s13 = inlined_call_operand.vmem [shape: f32[1,128], index: 13, kind: input, shape index: {}]   ;;  %s2250_s14 = inlined_call_operand.vmem [shape: bf16[2,8,128], index: 14, kind: output, shape index: {}]  }
   0x1   :  { %s1967_s15 = smov 0  }
   0x2 LB: > { %s36_s16 = sadd.s32 1, %s1876_s30  ;;  %p1588_p0 = scmp.ge.s32.totalorder %s1880_s15, 1  ;;  %s1880_s15 = sphi %s1967_s15, %s24_s15   ;;  %s1876_s30 = sphi %s1965_s30, %s2254_s30   ;;  %s1872_s29 = sphi %s1963_s29, %s2253_s29  }
   0x3   : > { %p38_p1 = scmp.ge.s32.totalorder %s36_s16, 2  ;;  %p462_p2 = scmp.lt.s32.totalorder %s1880_s15, 3 }
   0x5   : > { %s2256_s16 = smov (%p38_p1, %s36_s16), 0  ;;  %p463_p3 = pnand %p1588_p0, %p462_p2 }
   0x6   : > { %p527_p4 = scmp.lt.s32.totalorder (!%p463_p3), %s1872_s29, 1  ;;  %s1885_s21 = smov (!%p463_p3), 96  }
   0x7   : > { %466 = sbr.rel (%p463_p3) target bundleno = 2436 (0x984), region = 76  ;;  %s1886_s23 = smov (!%p463_p3), 64  }
   0x8   : > { %s1887_s24 = smov (!%p463_p3), 32  }
   0xc   : > { %v1797_v0 = vld [vmem:[%s2242_s6 + $0x74] ss:$8 sps:$4 sm:$0xff]   ;;  %v1799_v1 = vld [vmem:[%s2242_s6 + $0x70] ss:$8 sps:$4 sm:$0xff]   ;;  %v1882_v2 = vmov 0.0   ;;  %v1883_v3 = vmov 0   ;;  %v690_v28 = vlaneseq }
   0xd   : > { %1678 = vmatprep.subr.bf16.mxu0 %v1882_v2  ;;  %818 = vmatprep.mubr.bf16.mxu1 %v1883_v3  ;;  %v1800_v4 = vld [vmem:[%s2242_s6 + $0x64] ss:$8 sps:$4 sm:$0xff]   ;;  %v1802_v5 = vld [vmem:[%s2242_s6 + $0x60] ss:$8 sps:$4 sm:$0xff]   ;;  %vm1884_vm0 = vmmov 0   ;;  %v1803_v6 = vld [vmem:[%s2240_s4 + $0x38] sm:$0xff]  }
   0xe   : > { %786 = vmatprep.subr.bf16.mxu1 %v1797_v0  ;;  %1694 = vmatprep.mubr.msk.bf16.mxu0 %vm1884_vm0, %v1882_v2  ;;  %v1804_v7 = vld [vmem:[%s2242_s6 + $0x54] ss:$8 sps:$4 sm:$0xff]   ;;  %v1806_v9 = vld [vmem:[%s2242_s6 + $0x50] ss:$8 sps:$4 sm:$0xff]   ;;  %v1808_v10 = vld [vmem:[%s2242_s6 + $0x44] ss:$8 sps:$4 sm:$0xff]  }
   0xf   : > { %787 = vmatpush1.bf16.msra.mxu1 %v1799_v1  ;;  %1796 = vset.pattern.permute.xlu0 %v1883_v3  ;;  %v1807_v8 = vld [vmem:[%s2240_s4 + $0x30] sm:$0xff]   ;;  %v1811_v11 = vld [vmem:[%s2240_s4 + $0x28] sm:$0xff]   ;;  %s2258_s29 = smov (!%p527_p4, %s1872_s29), 1  ;;  %v1815_v14 = vld [vmem:[%s2240_s4 + $0x20] sm:$0xff]   ;;  %v691_v29 = vshrl.u32 %v690_v28, 7  ;;  %vm841_vm1 = vcmask 261120  }
  0x10   : > { %788 = vmatprep.subr.bf16.mxu1 %v1800_v4  ;;  %1679 = vmatpush3.bf16.msra.mxu0 %v1803_v6  ;;  %v1810_v12 = vld [vmem:[%s2242_s6 + $0x40] ss:$8 sps:$4 sm:$0xff]   ;;  %v1812_v13 = vld [vmem:[%s2242_s6 + $0x34] ss:$8 sps:$4 sm:$0xff]   ;;  %s1643_s19 = sshll.u32 %s2258_s29, 3  ;;  %s2251_s22 = sshll.u32 %s2258_s29, 2 }
  0x11   : > { %1680 = vmatprep.subr.bf16.mxu0 %v1882_v2  ;;  %v1814_v15 = vld [vmem:[%s2242_s6 + $0x30] ss:$8 sps:$4 sm:$0xff]   ;;  %v1816_v16 = vld [vmem:[%s2242_s6 + $0x24] ss:$8 sps:$4 sm:$0xff]   ;;  %s538_s26 = scalar_lea.vmem %s2237_s1, %s1643_s19  ;;  %v1818_v18 = vld [vmem:[%s2242_s6 + $0x20] ss:$8 sps:$4 sm:$0xff]   ;;  %s533_s28 = scalar_lea.vmem %s2236_s0, %s2251_s22 }
  0x12   : > { %v1819_v17 = vld [vmem:[%s2240_s4 + $0x18] sm:$0xff]   ;;  %v1823_v20 = vld [vmem:[%s2240_s4 + $0x10] sm:$0xff]   ;;  %v1824_v22 = vld [vmem:[%s2242_s6 + $0x4] ss:$8 sps:$4 sm:$0xff]   ;;  %v692_v30 = vsub.s32 0, %v691_v29  ;;  %v696_v42 = vsub.s32 1, %v691_v29  ;;  %s548_s27 = scalar_lea.vmem %s2239_s3, %s1643_s19 }
  0x13   : > { %789 = vmatpush1.bf16.msra.mxu1 %v1802_v5  ;;  %v1820_v19 = vld [vmem:[%s2242_s6 + $0x14] ss:$8 sps:$4 sm:$0xff]   ;;  %v1822_v21 = vld [vmem:[%s2242_s6 + $0x10] ss:$8 sps:$4 sm:$0xff]   ;;  %v1827_v23 = vld [vmem:[%s2240_s4 + $0x8] sm:$0xff]   ;;  %vm890_vm3 = vcmask 130048  }
  0x14   : > { %790 = vmatprep.subr.bf16.mxu1 %v1804_v7  ;;  %1681 = vmatpush3.bf16.msra.mxu0 %v1807_v8  ;;  %v1826_v24 = vld [vmem:[%s2242_s6] ss:$8 sps:$4 sm:$0xff]   ;;  %vm1292_vm4 = vcmask 523264   ;;  %vm1294_vm5 = vcmask 785408  }
  0x15   : > { %1682 = vmatprep.subr.bf16.mxu0 %v1882_v2  ;;  %v1829_v25 = vld [vmem:[%s2240_s4] sm:$0xff]  }
  0x16   : > { %v1828_v26 = vld [vmem:[%s538_s26] sm:$0xff]  }
  0x17   : > { %791 = vmatpush1.bf16.msra.mxu1 %v1806_v9  ;;  %v2082_v27 = vld [vmem:[%s533_s28] sm:$0xf]  ;;  %s541_s28 = scalar_lea.vmem %s2238_s2, %s2258_s29 }
  0x18   : > { %792 = vmatprep.subr.bf16.mxu1 %v1808_v10  ;;  %1683 = vmatpush3.bf16.msra.mxu0 %v1811_v11  ;;  %v688_v31 = vld [vmem:[%s2243_s7] sm:$0x3] }
  0x19   : > { %1684 = vmatprep.subr.bf16.mxu0 %v1882_v2  ;;  %v693_v33 = vrot.slane %v688_v31, %v692_v30  ;;  %v1594_v35 = vld [vmem:[%s2241_s5] ss:$0 sm:$0xff]  ;;  %v697_v49 = vrot.slane %v688_v31, %v696_v42 }
  0x1a   : > { %v829_v53 = vld [vmem:[%s541_s28] sm:$0x1] }
  0x1b   : > { %793 = vmatpush1.bf16.msra.mxu1 %v1810_v12  ;;  %vm830_vm2 = vcmp.eq.s32.totalorder %v829_v53, 0 }
  0x1c   : > { %794 = vmatprep.subr.bf16.mxu1 %v1812_v13  ;;  %1685 = vmatpush3.bf16.msra.mxu0 %v1815_v14  ;;  %v831_v54 = vsel %vm830_vm2, -1e+09, %v1882_v2 }
  0x1d   : > { %1686 = vmatprep.subr.bf16.mxu0 %v1882_v2  ;;  %v2115_v55 = vrot.slane %v831_v54, %v692_v30 }
  0x1f   : > { %795 = vmatpush1.bf16.msra.mxu1 %v1814_v15 }
  0x20   : > { %796 = vmatprep.subr.bf16.mxu1 %v1816_v16  ;;  %1687 = vmatpush3.bf16.msra.mxu0 %v1819_v17 }
  0x21   : > { %1688 = vmatprep.subr.bf16.mxu0 %v1882_v2 }
  0x23   : > { %797 = vmatpush1.bf16.msra.mxu1 %v1818_v18 }
  0x24   : > { %798 = vmatprep.subr.bf16.mxu1 %v1820_v19  ;;  %1689 = vmatpush3.bf16.msra.mxu0 %v1823_v20 }
  0x25   : > { %1690 = vmatprep.subr.bf16.mxu0 %v1882_v2 }
  0x27   : > { %799 = vmatpush1.bf16.msra.mxu1 %v1822_v21 }
  0x28   : > { %800 = vmatprep.subr.bf16.mxu1 %v1824_v22  ;;  %1691 = vmatpush3.bf16.msra.mxu0 %v1827_v23 }
  0x29   : > { %1692 = vmatprep.subr.bf16.mxu0 %v1882_v2 }
  0x2b   : > { %801 = vmatpush1.bf16.msra.mxu1 %v1826_v24 }
  0x2c   : > { %1698 = vmatprep.subr.bf16.mxu1 %v1882_v2  ;;  %1693 = vmatpush3.bf16.msra.mxu0 %v1829_v25 }
  0x2d   : > { %1722 = vmatprep.subr.bf16.mxu0 %v1882_v2 }
  0x2e   : > { %819 = vmatmul.mubr.bf16.vlgmr.msra.gmra.mxu1 %v1828_v26 }
  0x2f   : > { %1700 = vmatprep.mubr.msk.bf16.mxu1 %vm1884_vm0, %v1882_v2  ;;  %1695 = vmatmul.mubr.bf16.vlgmr.msra.gmra.mxu0 %v2082_v27 }
  0x30   : > { %1724 = vmatprep.mubr.msk.bf16.mxu0 %vm1884_vm0, %v1882_v2 }
  0xee   : > { %v820_v32 = vpop.f32.mrf.mxu1 }
  0xef   : > { %v666_v36 = vpop.f32.mrf.mxu0  ;;  %v821_v39 = vadd.f32 %v820_v32, %v693_v33 }
  0xf0   : > { %v822_v34 = vpop.f32.mrf.mxu1  ;;  %v667_v41 = vadd.f32 %v1594_v35, %v666_v36 }
  0xf1   : > { %v1696_v38 = vpop.f32.mrf.mxu0  ;;  %v823_v51 = vadd.f32 %v822_v34, %v697_v49 }
  0xf2   : > { %v824_v37 = vpop.f32.mrf.mxu1  ;;  %v838_v47 = vpack.c.bf16 %v667_v41, %v667_v41 }
  0xf3   : > { %v825_v40 = vadd.f32 %v824_v37, %v693_v33  ;;  %v669_v43 = vpop.f32.mrf.mxu0 }
  0xf4   : > { %v826_v46 = vpop.f32.mrf.mxu1 }
  0xf5   : > { %v839_v44 = vpack.c.bf16 %v825_v40, %v821_v39  ;;  %v1697_v45 = vpop.f32.mrf.mxu0  ;;  %v827_v50 = vadd.f32 %v826_v46, %v697_v49 }
  0xf7   : > { %950 = vrot.lane.b32.xlu1 %v839_v44, %s1885_s21  ;;  %v846_v48 = vsel %vm841_vm1, %v839_v44, 0  ;;  %v2100_v52 = vpack.c.bf16 %v827_v50, %v823_v51 }
  0xf8   : > { %1699 = vmatpush3.bf16.xpose.msra.mxu1 %v846_v48 }
  0xf9   : > { %1704 = vmatprep.subr.bf16.mxu1 %v1882_v2 }
  0xfb   : > { %947 = vrot.lane.b32.xlu1 %v838_v47, %s1885_s21 }
  0xff   : > { %1059 = vrot.lane.b32.xlu1 %v838_v47, %s1886_s23  ;;  %1701 = vmatmul.mubr.msk.bf16.vlgmr.msra.gmra.mxu1 %vm841_vm1, %v838_v47 }
 0x100   : > { %1705 = vmatpush3.bf16.msra.mxu1 %v2100_v52  ;;  %1706 = vmatprep.mubr.msk.bf16.mxu1 %vm1884_vm0, %v1882_v2 }
 0x101   : > { %1710 = vmatprep.subr.bf16.mxu1 %v1882_v2 }
 0x103   : > { %1171 = vrot.lane.b32.xlu1 %v839_v44, %s1887_s24 }
 0x107   : > { %1169 = vrot.lane.b32.xlu1 %v838_v47, %s1887_s24 }
 0x169   : > { %v951_v5 = vpop.permute.xlu1 %950 }
 0x16a   : > { %v956_v16 = vsel %vm841_vm1, %v951_v5, 0 }
 0x16d   : > { %v948_v6 = vpop.permute.xlu1 %947 }
 0x171   : > { %v1060_v8 = vpop.permute.xlu1 %1059 }
 0x175   : > { %v1172_v11 = vpop.permute.xlu1 %1171 }
 0x176   : > { %v1177_v12 = vsel %vm841_vm1, %v1172_v11, 0  ;;  %v1830_v11 = vld [vmem:[%s2244_s8 + $0x38] sm:$0xff]  }
 0x179   : > { %v1170_v17 = vpop.permute.xlu1 %1169 }
 0x1bf   : > { %v882_v56 = vpop.f32.mrf.mxu1 }
 0x1c0   : > { %v888_v57 = vmul.f32 0.17677669, %v882_v56 }
 0x1c1   : > { %v1702_v58 = vpop.f32.mrf.mxu1 }
 0x1c2   : > { %v889_v59 = vadd.f32 %v888_v57, %v2115_v55 }
 0x1c3   : > { %v885_v60 = vpop.f32.mrf.mxu1 }
 0x1c4   : > { %v891_v61 = vsel %vm890_vm3, %v889_v59, -inf }
 0x1c5   : > { %892 = vmax.xlane.f32.xlu0 %v891_v61  ;;  %v1703_v62 = vpop.f32.mrf.mxu1 }
 0x24e   : > { %v893_v63 = vpop.xlane.xlu0 %892 }
 0x24f   : > { %v894_v0 = vsub.f32 %v889_v59, %v893_v63 }
 0x251   : > { %v895_v1 = vmul.f32 1.442695, %v894_v0 }
 0x253   : > { %1838 = vpow2.f32 %v895_v1 }
 0x260   : > { %v1839_v3 = vpop.eup %1838 }
 0x261   : > { %v897_v4 = vsel %vm890_vm3, %v1839_v3, 0.0 }
 0x262   : > { %898 = vadd.xlane.f32.xlu0 %v897_v4 }
 0x278   : > { %1061 = vrot.lane.b32.xlu0 %v839_v44, %s1886_s23 }
 0x2eb   : > { %v899_v7 = vpop.xlane.xlu0 %898 }
 0x2ec   : > { %1840 = vrcp.f32 %v899_v7 }
 0x2ef   : > { %v1062_v9 = vpop.permute.xlu0 %1061 }
 0x2f0   : > { %v1067_v10 = vsel %vm841_vm1, %v1062_v9, 0 }
 0x2f1   : > { %1723 = vmatpush3.bf16.xpose.msra.mxu0 %v1067_v10 }
 0x2f2   : > { %1734 = vmatprep.subr.bf16.mxu0 %v1882_v2 }
 0x2f8   : > { %1725 = vmatmul.mubr.msk.bf16.vlgmr.msra.gmra.mxu0 %vm841_vm1, %v1060_v8 }
 0x2f9   : > { %v1841_v13 = vpop.eup %1840  ;;  %1735 = vmatpush3.bf16.xpose.msra.mxu0 %v1177_v12  ;;  %1736 = vmatprep.mubr.msk.bf16.mxu0 %vm1884_vm0, %v1882_v2  ;;  %v1831_v12 = vld [vmem:[%s2244_s8 + $0x30] sm:$0xff]  }
 0x2fa   : > { %v901_v14 = vmul.f32 %v1841_v13, %v1839_v3  ;;  %1746 = vmatprep.subr.bf16.mxu0 %v1882_v2  ;;  %v1832_v13 = vld [vmem:[%s2244_s8 + $0x28] sm:$0xff]  }
 0x2fc   : > { %v902_v15 = vpack.c.bf16 %v901_v14, %v901_v14  ;;  %v1833_v14 = vld [vmem:[%s2244_s8 + $0x20] sm:$0xff]  }
 0x2fe   : > { %1707 = vmatmul.mubr.msk.bf16.vlgmr.msra.gmra.mxu1 %vm890_vm3, %v902_v15  ;;  %v1834_v15 = vld [vmem:[%s2244_s8 + $0x18] sm:$0xff]  }
 0x2ff   : > { %1711 = vmatpush3.bf16.xpose.msra.mxu1 %v956_v16  ;;  %1712 = vmatprep.mubr.msk.bf16.mxu1 %vm1884_vm0, %v1882_v2  ;;  %v1835_v16 = vld [vmem:[%s2244_s8 + $0x10] sm:$0xff]  }
 0x300   : > { %1737 = vmatmul.mubr.msk.bf16.vlgmr.msra.gmra.mxu0 %vm841_vm1, %v1170_v17  ;;  %1716 = vmatprep.subr.bf16.mxu1 %v1882_v2  ;;  %v1836_v17 = vld [vmem:[%s2244_s8 + $0x8] sm:$0xff]  }
 0x301   : > { %1762 = vmatprep.mubr.msk.bf16.mxu0 %vm1884_vm0, %v1882_v2  ;;  %1747 = vmatpush3.bf16.msra.mxu0 %v1830_v11 }
 0x302   : > { %1748 = vmatprep.subr.bf16.mxu0 %v1882_v2 }
 0x305   : > { %1749 = vmatpush3.bf16.msra.mxu0 %v1831_v12 }
 0x306   : > { %1713 = vmatmul.mubr.msk.bf16.vlgmr.msra.gmra.mxu1 %vm841_vm1, %v948_v6  ;;  %1750 = vmatprep.subr.bf16.mxu0 %v1882_v2 }
 0x307   : > { %1718 = vmatprep.mubr.msk.bf16.mxu1 %vm1884_vm0, %v1882_v2 }
 0x309   : > { %1751 = vmatpush3.bf16.msra.mxu0 %v1832_v13 }
 0x30a   : > { %1752 = vmatprep.subr.bf16.mxu0 %v1882_v2 }
 0x30d   : > { %1753 = vmatpush3.bf16.msra.mxu0 %v1833_v14 }
 0x30e   : > { %1754 = vmatprep.subr.bf16.mxu0 %v1882_v2 }
 0x311   : > { %1755 = vmatpush3.bf16.msra.mxu0 %v1834_v15 }
 0x312   : > { %1756 = vmatprep.subr.bf16.mxu0 %v1882_v2 }
 0x315   : > { %1757 = vmatpush3.bf16.msra.mxu0 %v1835_v16 }
 0x316   : > { %1758 = vmatprep.subr.bf16.mxu0 %v1882_v2 }
 0x319   : > { %1759 = vmatpush3.bf16.msra.mxu0 %v1836_v17 }
 0x31a   : > { %1760 = vmatprep.subr.bf16.mxu0 %v1882_v2 }
 0x3b8   : > { %v1103_v18 = vpop.f32.mrf.mxu0 }
 0x3b9   : > { %v1109_v19 = vmul.f32 0.17677669, %v1103_v18 }
 0x3ba   : > { %v1726_v20 = vpop.f32.mrf.mxu0 }
 0x3bb   : > { %v1110_v21 = vadd.f32 %v1109_v19, %v2115_v55  ;;  %v1837_v20 = vld [vmem:[%s2244_s8] sm:$0xff]  }
 0x3bc   : > { %v1106_v22 = vpop.f32.mrf.mxu0  ;;  %1761 = vmatpush3.bf16.msra.mxu0 %v1837_v20 }
 0x3bd   : > { %v1111_v23 = vsel %vm890_vm3, %v1110_v21, -inf }
 0x3be   : > { %v2141_v24 = vpop.f32.mrf.mxu1  ;;  %1112 = vmax.xlane.f32.xlu0 %v1111_v23  ;;  %v1727_v25 = vpop.f32.mrf.mxu0 }
 0x3c0   : > { %v1708_v26 = vpop.f32.mrf.mxu1  ;;  %v1213_v28 = vpop.f32.mrf.mxu0 }
 0x3c1   : > { %v1219_v35 = vmul.f32 0.17677669, %v1213_v28 }
 0x3c2   : > { %v943_v29 = vpop.f32.mrf.mxu1  ;;  %v1738_v30 = vpop.f32.mrf.mxu0 }
 0x3c3   : > { %v1220_v41 = vadd.f32 %v1219_v35, %v2115_v55 }
 0x3c4   : > { %v1709_v31 = vpop.f32.mrf.mxu1  ;;  %v1216_v32 = vpop.f32.mrf.mxu0 }
 0x3c5   : > { %v1221_v43 = vsel %vm890_vm3, %v1220_v41, -inf }
 0x3c6   : > { %v992_v33 = vpop.f32.mrf.mxu1  ;;  %v1739_v34 = vpop.f32.mrf.mxu0 }
 0x3c7   : > { %v998_v36 = vmul.f32 0.17677669, %v992_v33 }
 0x3c8   : > { %v1714_v37 = vpop.f32.mrf.mxu1 }
 0x3c9   : > { %v999_v38 = vadd.f32 %v998_v36, %v2115_v55 }
 0x3ca   : > { %v995_v39 = vpop.f32.mrf.mxu1 }
 0x3cb   : > { %v1000_v40 = vsel %vm890_vm3, %v999_v38, -inf  ;;  %v1628_v39 = vld [vmem:[%s2245_s9] ss:$0 sm:$0xff] }
 0x3cc   : > { %1001 = vmax.xlane.f32.xlu1 %v1000_v40  ;;  %v1715_v42 = vpop.f32.mrf.mxu1  ;;  %v558_v40 = vunpack.c.l.bf16 %v2082_v27  ;;  %v1637_v27 = vld [vmem:[%s2246_s10] ss:$0 sm:$0xff] }
 0x3d0   : > { %1222 = vmax.xlane.f32.xlu1 %v1221_v43 }
 0x447   : > { %v1113_v44 = vpop.xlane.xlu0 %1112 }
 0x448   : > { %v1114_v45 = vsub.f32 %v1110_v21, %v1113_v44 }
 0x44a   : > { %v1115_v46 = vmul.f32 1.442695, %v1114_v45 }
 0x44c   : > { %1842 = vpow2.f32 %v1115_v46 }
 0x455   : > { %v1002_v47 = vpop.xlane.xlu1 %1001 }
 0x456   : > { %v1003_v48 = vsub.f32 %v999_v38, %v1002_v47 }
 0x458   : > { %v1004_v54 = vmul.f32 1.442695, %v1003_v48 }
 0x459   : > { %v1843_v49 = vpop.eup %1842  ;;  %v1223_v50 = vpop.xlane.xlu1 %1222 }
 0x45a   : > { %v1224_v51 = vsub.f32 %v1220_v41, %v1223_v50  ;;  %v1117_v53 = vsel %vm890_vm3, %v1843_v49, 0.0 }
 0x45b   : > { %1118 = vadd.xlane.f32.xlu0 %v1117_v53 }
 0x45c   : > { %v1225_v56 = vmul.f32 1.442695, %v1224_v51 }
 0x45e   : > { %1844 = vpow2.f32 %v1225_v56 }
 0x45f   : > { %1846 = vpow2.f32 %v1004_v54 }
 0x46b   : > { %v1845_v55 = vpop.eup %1844 }
 0x46c   : > { %v1227_v57 = vsel %vm890_vm3, %v1845_v55, 0.0  ;;  %v1847_v58 = vpop.eup %1846 }
 0x46d   : > { %1228 = vadd.xlane.f32.xlu1 %v1227_v57  ;;  %v1006_v59 = vsel %vm890_vm3, %v1847_v58, 0.0 }
 0x471   : > { %1013 = vrot.lane.b32.xlu0 %v2100_v52, %s1885_s21  ;;  %1007 = vadd.xlane.f32.xlu1 %v1006_v59 }
 0x482   : > { %1123 = vrot.lane.b32.xlu1 %v2100_v52, %s1886_s23 }
 0x486   : > { %1233 = vrot.lane.b32.xlu1 %v2100_v52, %s1887_s24 }
 0x4e4   : > { %v1119_v60 = vpop.xlane.xlu0 %1118 }
 0x4e8   : > { %v1014_v61 = vpop.permute.xlu0 %1013 }
 0x4e9   : > { %1717 = vmatpush3.bf16.msra.mxu1 %v1014_v61 }
 0x4ea   : > { %1728 = vmatprep.subr.bf16.mxu1 %v1882_v2 }
 0x4f6   : > { %v1229_v62 = vpop.xlane.xlu1 %1228 }
 0x4fa   : > { %v1008_v63 = vpop.xlane.xlu1 %1007 }
 0x4fb   : > { %1848 = vrcp.f32 %v1008_v63 }
 0x4fc   : > { %1850 = vrcp.f32 %v1119_v60  ;;  %v1465_v60 = vld [vmem:[%s548_s27] sm:$0xff] }
 0x4fd   : > { %1852 = vrcp.f32 %v1229_v62 }
 0x4fe   : > { %v1124_v5 = vpop.permute.xlu1 %1123 }
 0x502   : > { %v1234_v8 = vpop.permute.xlu1 %1233 }
 0x508   : > { %v1849_v0 = vpop.eup %1848 }
 0x509   : > { %v1010_v1 = vmul.f32 %v1849_v0, %v1847_v58  ;;  %v1851_v4 = vpop.eup %1850 }
 0x50a   : > { %v1121_v52 = vmul.f32 %v1851_v4, %v1843_v49  ;;  %v1853_v7 = vpop.eup %1852 }
 0x50b   : > { %v1011_v3 = vpack.c.bf16 %v1010_v1, %v1010_v1  ;;  %v1231_v9 = vmul.f32 %v1853_v7, %v1845_v55  ;;  %v1638_v55 = vld [vmem:[%s2247_s11] ss:$0 sm:$0xff] }
 0x50c   : > { %v1122_v6 = vpack.c.bf16 %v1121_v52, %v1121_v52  ;;  %v1639_v52 = vld [vmem:[%s2248_s12] ss:$0 sm:$0xff] }
 0x50d   : > { %1719 = vmatmul.mubr.msk.bf16.vlgmr.msra.gmra.mxu1 %vm890_vm3, %v1011_v3  ;;  %v1232_v10 = vpack.c.bf16 %v1231_v9, %v1231_v9  ;;  %v1640_v7 = vld [vmem:[%s2249_s13] ss:$0 sm:$0xff] }
 0x50e   : > { %1729 = vmatpush3.bf16.msra.mxu1 %v1124_v5  ;;  %1730 = vmatprep.mubr.msk.bf16.mxu1 %vm1884_vm0, %v1882_v2 }
 0x50f   : > { %1740 = vmatprep.subr.bf16.mxu1 %v1882_v2 }
 0x515   : > { %1731 = vmatmul.mubr.msk.bf16.vlgmr.msra.gmra.mxu1 %vm890_vm3, %v1122_v6 }
 0x516   : > { %1741 = vmatpush3.bf16.msra.mxu1 %v1234_v8  ;;  %1742 = vmatprep.mubr.msk.bf16.mxu1 %vm1884_vm0, %v1882_v2 }
 0x51d   : > { %1743 = vmatmul.mubr.msk.bf16.vlgmr.msra.gmra.mxu1 %vm890_vm3, %v1232_v10 }
 0x5cd   : > { %v1053_v18 = vpop.f32.mrf.mxu1 }
 0x5ce   : > { %1280 = vrot.lane.b32.xlu0 %v1053_v18, %s1887_s24 }
 0x5cf   : > { %v1720_v19 = vpop.f32.mrf.mxu1 }
 0x5d1   : > { %v1056_v21 = vpop.f32.mrf.mxu1 }
 0x5d3   : > { %v1721_v22 = vpop.f32.mrf.mxu1 }
 0x5d5   : > { %v1163_v23 = vpop.f32.mrf.mxu1 }
 0x5d6   : > { %1284 = vrot.lane.b32.xlu1 %v1163_v23, %s1886_s23  ;;  %s2252_s23 = sshll.u32 %s2258_s29, 2 }
 0x5d7   : > { %v1732_v25 = vpop.f32.mrf.mxu1  ;;  %s555_s17 = scalar_lea.vmem %s2250_s14, %s2252_s23 }
 0x5d9   : > { %v1166_v26 = vpop.f32.mrf.mxu1 }
 0x5db   : > { %v1733_v28 = vpop.f32.mrf.mxu1 }
 0x5dd   : > { %v1273_v29 = vpop.f32.mrf.mxu1 }
 0x5de   : > { %1288 = vrot.lane.b32.xlu0 %v1273_v29, %s1885_s21 }
 0x5df   : > { %v1744_v30 = vpop.f32.mrf.mxu1 }
 0x5e1   : > { %v1276_v31 = vpop.f32.mrf.mxu1 }
 0x5e3   : > { %v1745_v32 = vpop.f32.mrf.mxu1 }
 0x640   : > { %v1281_v2 = vpop.permute.xlu0 %1280 }
 0x641   : > { %v1291_v34 = vsel %vm841_vm1, %v2141_v24, %v1281_v2 }
 0x648   : > { %v1285_v33 = vpop.permute.xlu1 %1284 }
 0x649   : > { %v1293_v35 = vsel %vm1292_vm4, %v1291_v34, %v1285_v33 }
 0x650   : > { %v1289_v36 = vpop.permute.xlu0 %1288 }
 0x651   : > { %v1295_v37 = vsel %vm1294_vm5, %v1293_v35, %v1289_v36 }
 0x652   : > { %v1296_v38 = vpack.c.bf16 %v1295_v37, %v1295_v37 }
 0x654   : > { %1763 = vmatmul.mubr.bf16.vlgmr.msra.gmra.mxu0 %v1296_v38 }
 0x714   : > { %v1402_v41 = vpop.f32.mrf.mxu0 }
 0x715   : > { %v1403_v42 = vadd.f32 %v1628_v39, %v1402_v41 }
 0x716   : > { %v1764_v43 = vpop.f32.mrf.mxu0 }
 0x717   : > { %v1408_v44 = vadd.f32 %v1403_v42, %v558_v40 }
 0x718   : > { %v1405_v45 = vpop.f32.mrf.mxu0 }
 0x719   : > { %1411 = vadd.xlane.f32.xlu1 %v1408_v44 }
 0x71a   : > { %v1765_v46 = vpop.f32.mrf.mxu0 }
 0x7a2   : > { %v1412_v47 = vpop.xlane.xlu1 %1411 }
 0x7a3   : > { %v1414_v24 = vmul.f32 0.0078125, %v1412_v47 }
 0x7a5   : > { %v1415_v48 = vsub.f32 %v1408_v44, %v1414_v24 }
 0x7a7   : > { %v1416_v49 = vmul.f32 %v1415_v48, %v1415_v48 }
 0x7a9   : > { %1417 = vadd.xlane.f32.xlu0 %v1416_v49 }
 0x832   : > { %v1418_v50 = vpop.xlane.xlu0 %1417 }
 0x833   : > { %v1419_v51 = vmul.f32 0.0078125, %v1418_v50 }
 0x835   : > { %v1420_v53 = vadd.f32 1e-05, %v1419_v51 }
 0x837   : > { %1854 = vrsqrt.f32 %v1420_v53 }
 0x844   : > { %v1855_v54 = vpop.eup %1854 }
 0x845   : > { %v1422_v56 = vmul.f32 %v1855_v54, %v1415_v48 }
 0x847   : > { %v1429_v57 = vmul.f32 %v1637_v27, %v1422_v56 }
 0x849   : > { %v1436_v58 = vadd.f32 %v1638_v55, %v1429_v57 }
 0x84b   : > { %v1437_v59 = vadd.f32 %v1436_v58, %v558_v40 }
 0x84d   : > { %1440 = vadd.xlane.f32.xlu0 %v1437_v59 }
 0x863   : > { %1468 = vperm.xlu0 %1796, %v1465_v60  }
 0x8d6   : > { %v1441_v61 = vpop.xlane.xlu0 %1440 }
 0x8d7   : > { %v1442_v62 = vmul.f32 0.0078125, %v1441_v61 }
 0x8d9   : > { %v1443_v63 = vsub.f32 %v1437_v59, %v1442_v62 }
 0x8db   : > { %v1444_v0 = vmul.f32 %v1443_v63, %v1443_v63 }
 0x8dd   : > { %1445 = vadd.xlane.f32.xlu1 %v1444_v0 }
 0x8de   : > { %v1469_v9 = vpop.permute.xlu0 %1468 }
 0x966   : > { %v1446_v1 = vpop.xlane.xlu1 %1445 }
 0x967   : > { %v1447_v3 = vmul.f32 0.0078125, %v1446_v1 }
 0x969   : > { %v1448_v4 = vadd.f32 1e-05, %v1447_v3 }
 0x96b   : > { %1856 = vrsqrt.f32 %v1448_v4 }
 0x978   : > { %v1857_v5 = vpop.eup %1856 }
 0x979   : > { %v1450_v6 = vmul.f32 %v1857_v5, %v1443_v63 }
 0x97b   : > { %v1457_v8 = vmul.f32 %v1639_v52, %v1450_v6 }
 0x97d   : > { %v1464_v10 = vadd.f32 %v1640_v7, %v1457_v8 }
 0x97f   : > { %v1471_v11 = vmul.f32 %v1469_v9, %v1464_v10 }
 0x981   : > { %v1472_v12 = vpack.c.bf16 %v1471_v11, %v1471_v11 }
 0x983   : > { %1473 = vst [vmem:[%s555_s17] sm:$0xf] %v1472_v12 }
 0x984 PF: > { %s24_s15 = sadd.s32 1, %s1880_s15   ;;  %s2253_s29 = smov %s1876_s30 }
 0x985   : > { %p21_p5 = scmp.ge.s32.totalorder %s24_s15, 4   ;;  %s2254_s30 = smov %s2256_s16 }
 0x987   :  { %23 = sbr.rel (!%p21_p5) target bundleno = 2 (0x2), region = 115 }

// kernel: transformer_decoder_forward.7
= control target key start
LH: loop header
LB: loop body
LE: loop exit
PB: predicated region body
PF: predicated region fallthrough
CT: control target
= control target key end

     0   :  { %s1735_s17 = smov 0   ;;  %s1986_s0 = inlined_call_operand.vmem [shape: bf16[2,8,128], index: 0, kind: input, shape index: {}]   ;;  %s1987_s1 = inlined_call_operand.vmem [shape: s32[2,1,8], index: 1, kind: input, shape index: {}]   ;;  %s1988_s2 = inlined_call_operand.vmem [shape: f32[2,8,1], index: 2, kind: input, shape index: {}]   ;;  %s1989_s3 = inlined_call_operand.vmem [shape: bf16[128,384], index: 3, kind: input, shape index: {}]   ;;  %s1990_s4 = inlined_call_operand.vmem [shape: f32[1,384], index: 4, kind: input, shape index: {}]   ;;  %s1991_s5 = inlined_call_operand.vmem [shape: bf16[128,128], index: 5, kind: input, shape index: {}]   ;;  %s1992_s6 = inlined_call_operand.vmem [shape: f32[1,128], index: 6, kind: input, shape index: {}]   ;;  %s1993_s7 = inlined_call_operand.vmem [shape: f32[1,128], index: 7, kind: input, shape index: {}]   ;;  %s1994_s8 = inlined_call_operand.vmem [shape: f32[1,128], index: 8, kind: input, shape index: {}]   ;;  %s1995_s9 = inlined_call_operand.vmem [shape: f32[1,128], index: 9, kind: input, shape index: {}]   ;;  %s1996_s10 = inlined_call_operand.vmem [shape: f32[1,128], index: 10, kind: input, shape index: {}]   ;;  %s1997_s11 = inlined_call_operand.vmem [shape: bf16[2,8,128], index: 11, kind: output, shape index: {}]  }
   0x1 LB: > { %s1409_s18 = sadd.s32 4294967295, %s1667_s17   ;;  %p1413_p0 = scmp.ge.s32.totalorder %s1667_s17, 1  ;;  %s1667_s17 = sphi %s1735_s17, %s21_s17  }
   0x2   : > { %p353_p1 = scmp.lt.s32.totalorder %s1667_s17, 3 }
   0x4   : > { %p354_p2 = pnand %p1413_p0, %p353_p1 }
   0x5   : > { %p398_p3 = scmp.lt.s32.totalorder (!%p354_p2), %s1409_s18, 1  ;;  %s1672_s22 = smov (!%p354_p2), 96  }
   0x6   : > { %357 = sbr.rel (%p354_p2) target bundleno = 2433 (0x981), region = 64  ;;  %s1673_s24 = smov (!%p354_p2), 64  }
   0x7   : > { %s1674_s25 = smov (!%p354_p2), 32  }
   0xb   : > { %v1601_v0 = vld [vmem:[%s1989_s3 + $0xac] ss:$12 sps:$4 sm:$0xff]   ;;  %v1603_v1 = vld [vmem:[%s1989_s3 + $0xa8] ss:$12 sps:$4 sm:$0xff]   ;;  %v1669_v2 = vmov 0   ;;  %v1670_v4 = vmov 0.0   ;;  %v450_v27 = vlaneseq }
   0xc   : > { %625 = vmatprep.mubr.bf16.mxu0 %v1669_v2  ;;  %1600 = vset.pattern.permute.xlu0 %v1669_v2  ;;  %v1604_v3 = vld [vmem:[%s1989_s3 + $0x94] ss:$12 sps:$4 sm:$0xff]   ;;  %v1606_v5 = vld [vmem:[%s1989_s3 + $0x90] ss:$12 sps:$4 sm:$0xff]   ;;  %v1609_v7 = vld [vmem:[%s1989_s3 + $0x78] ss:$12 sps:$4 sm:$0xff]  }
   0xd   : > { %593 = vmatprep.subr.bf16.mxu0 %v1601_v0  ;;  %1498 = vmatprep.subr.bf16.mxu1 %v1670_v4  ;;  %v1607_v6 = vld [vmem:[%s1989_s3 + $0x7c] ss:$12 sps:$4 sm:$0xff]   ;;  %v1610_v8 = vld [vmem:[%s1989_s3 + $0x64] ss:$12 sps:$4 sm:$0xff]   ;;  %v1612_v9 = vld [vmem:[%s1989_s3 + $0x60] ss:$12 sps:$4 sm:$0xff]  }
   0xe   : > { %594 = vmatpush1.bf16.msra.mxu0 %v1603_v1  ;;  %v1613_v10 = vld [vmem:[%s1989_s3 + $0x4c] ss:$12 sps:$4 sm:$0xff]   ;;  %v1625_v11 = vld [vmem:[%s1989_s3 + $0xb0] ss:$12 sps:$4 sm:$0xff]   ;;  %s1999_s18 = smov (!%p398_p3, %s1409_s18), 1  ;;  %vm1671_vm0 = vmmov 0  }
   0xf   : > { %595 = vmatprep.subr.bf16.mxu0 %v1604_v3  ;;  %1499 = vmatpush3.bf16.msra.mxu1 %v1625_v11  ;;  %v1626_v12 = vld [vmem:[%s1989_s3 + $0x98] ss:$12 sps:$4 sm:$0xff]   ;;  %v1615_v13 = vld [vmem:[%s1989_s3 + $0x48] ss:$12 sps:$4 sm:$0xff]   ;;  %v1618_v15 = vld [vmem:[%s1989_s3 + $0x30] ss:$12 sps:$4 sm:$0xff]   ;;  %s404_s28 = scalar_lea.vmem %s1987_s1, %s1999_s18 }
  0x10   : > { %1500 = vmatprep.subr.bf16.mxu1 %v1670_v4  ;;  %v1616_v14 = vld [vmem:[%s1989_s3 + $0x34] ss:$12 sps:$4 sm:$0xff]   ;;  %v1619_v17 = vld [vmem:[%s1989_s3 + $0x1c] ss:$12 sps:$4 sm:$0xff]   ;;  %v1621_v19 = vld [vmem:[%s1989_s3 + $0x18] ss:$12 sps:$4 sm:$0xff]   ;;  %1514 = vmatprep.mubr.msk.bf16.mxu1 %vm1671_vm0, %v1670_v4 }
  0x11   : > { %v1627_v16 = vld [vmem:[%s1989_s3 + $0x80] ss:$12 sps:$4 sm:$0xff]   ;;  %v1628_v18 = vld [vmem:[%s1989_s3 + $0x68] ss:$12 sps:$4 sm:$0xff]   ;;  %v1622_v20 = vld [vmem:[%s1989_s3 + $0x4] ss:$12 sps:$4 sm:$0xff]  }
  0x12   : > { %596 = vmatpush1.bf16.msra.mxu0 %v1606_v5  ;;  %s1414_s23 = sshll.u32 %s1999_s18, 2  ;;  %v1629_v21 = vld [vmem:[%s1989_s3 + $0x50] ss:$12 sps:$4 sm:$0xff]   ;;  %v1624_v22 = vld [vmem:[%s1989_s3] ss:$12 sps:$4 sm:$0xff]   ;;  %v451_v28 = vshrl.u32 %v450_v27, 7 }
  0x13   : > { %597 = vmatprep.subr.bf16.mxu0 %v1607_v6  ;;  %1501 = vmatpush3.bf16.msra.mxu1 %v1626_v12  ;;  %s401_s30 = scalar_lea.vmem %s1986_s0, %s1414_s23  ;;  %v1630_v23 = vld [vmem:[%s1989_s3 + $0x38] ss:$12 sps:$4 sm:$0xff]   ;;  %v1631_v25 = vld [vmem:[%s1989_s3 + $0x20] ss:$12 sps:$4 sm:$0xff]   ;;  %v1632_v26 = vld [vmem:[%s1989_s3 + $0x8] ss:$12 sps:$4 sm:$0xff]  }
  0x14   : > { %1502 = vmatprep.subr.bf16.mxu1 %v1670_v4  ;;  %v1824_v24 = vld [vmem:[%s401_s30] sm:$0xf]  ;;  %v456_v29 = vsub.s32 1, %v451_v28  ;;  %v452_v30 = vsub.s32 0, %v451_v28  ;;  %vm692_vm1 = vcmask 261120   ;;  %v460_v43 = vsub.s32 2, %v451_v28 }
  0x15   : > { %v448_v31 = vld [vmem:[%s1990_s4] sm:$0x7]  ;;  %vm757_vm2 = vcmask 1043456   ;;  %v678_v55 = vand.u32 127, %v450_v27  ;;  %vm741_vm7 = vcmask 64512   ;;  %vm1153_vm8 = vcmask 523264  }
  0x16   : > { %598 = vmatpush1.bf16.msra.mxu0 %v1609_v7  ;;  %v457_v32 = vrot.slane %v448_v31, %v456_v29  ;;  %v453_v34 = vrot.slane %v448_v31, %v452_v30  ;;  %v461_v44 = vrot.slane %v448_v31, %v460_v43  ;;  %v674_v52 = vld [vmem:[%s404_s28] sm:$0x1]  ;;  %vm1155_vm9 = vcmask 785408   ;;  %s1415_s16 = sshll.u32 %s1999_s18, 3 }
  0x17   : > { %599 = vmatprep.subr.bf16.mxu0 %v1610_v8  ;;  %1503 = vmatpush3.bf16.msra.mxu1 %v1627_v16  ;;  %vm680_vm3 = vcmp.eq.s32.totalorder %v674_v52, 0  ;;  %vm679_vm5 = vcmp.gt.s32.totalorder %v678_v55, %v451_v28  ;;  %s408_s21 = scalar_lea.vmem %s1988_s2, %s1415_s16 }
  0x18   : > { %1504 = vmatprep.subr.bf16.mxu1 %v1670_v4  ;;  %v681_v53 = vsel %vm680_vm3, 1, %v1669_v2 }
  0x19   : > { %v685_v54 = vrot.slane %v681_v53, %v452_v30 }
  0x1a   : > { %600 = vmatpush1.bf16.msra.mxu0 %v1612_v9 }
  0x1b   : > { %601 = vmatprep.subr.bf16.mxu0 %v1613_v10  ;;  %1505 = vmatpush3.bf16.msra.mxu1 %v1628_v18  ;;  %vm686_vm4 = vcmp.eq.s32.totalorder %v685_v54, 1 }
  0x1c   : > { %1506 = vmatprep.subr.bf16.mxu1 %v1670_v4  ;;  %vm687_vm6 = vmor %vm679_vm5, %vm686_vm4 }
  0x1d   : > { %v1869_v57 = vsel %vm687_vm6, -1e+09, %v1670_v4 }
  0x1e   : > { %602 = vmatpush1.bf16.msra.mxu0 %v1615_v13 }
  0x1f   : > { %603 = vmatprep.subr.bf16.mxu0 %v1616_v14  ;;  %1507 = vmatpush3.bf16.msra.mxu1 %v1629_v21 }
  0x20   : > { %1508 = vmatprep.subr.bf16.mxu1 %v1670_v4 }
  0x22   : > { %604 = vmatpush1.bf16.msra.mxu0 %v1618_v15 }
  0x23   : > { %605 = vmatprep.subr.bf16.mxu0 %v1619_v17  ;;  %1509 = vmatpush3.bf16.msra.mxu1 %v1630_v23 }
  0x24   : > { %1510 = vmatprep.subr.bf16.mxu1 %v1670_v4 }
  0x26   : > { %606 = vmatpush1.bf16.msra.mxu0 %v1621_v19 }
  0x27   : > { %607 = vmatprep.subr.bf16.mxu0 %v1622_v20  ;;  %1511 = vmatpush3.bf16.msra.mxu1 %v1631_v25 }
  0x28   : > { %1512 = vmatprep.subr.bf16.mxu1 %v1670_v4 }
  0x2a   : > { %608 = vmatpush1.bf16.msra.mxu0 %v1624_v22 }
  0x2b   : > { %1542 = vmatprep.subr.bf16.mxu0 %v1670_v4  ;;  %1513 = vmatpush3.bf16.msra.mxu1 %v1632_v26 }
  0x2c   : > { %1518 = vmatprep.subr.bf16.mxu1 %v1670_v4 }
  0x2d   : > { %626 = vmatmul.mubr.bf16.vlgmr.msra.gmra.mxu0 %v1824_v24 }
  0x2e   : > { %1544 = vmatprep.mubr.msk.bf16.mxu0 %vm1671_vm0, %v1670_v4  ;;  %1515 = vmatmul.mubr.bf16.vlgmr.msra.gmra.mxu1 %v1824_v24 }
  0x2f   : > { %1520 = vmatprep.mubr.msk.bf16.mxu1 %vm1671_vm0, %v1670_v4 }
  0xed   : > { %v627_v33 = vpop.f32.mrf.mxu0 }
  0xee   : > { %v628_v38 = vadd.f32 %v627_v33, %v453_v34  ;;  %v668_v45 = vpop.f32.mrf.mxu1 }
  0xef   : > { %v629_v35 = vpop.f32.mrf.mxu0  ;;  %v669_v46 = vadd.f32 %v668_v45, %v461_v44 }
  0xf0   : > { %v630_v36 = vadd.f32 %v629_v35, %v457_v32  ;;  %v689_v42 = vpack.c.bf16 %v628_v38, %v628_v38  ;;  %v1516_v47 = vpop.f32.mrf.mxu1 }
  0xf1   : > { %v631_v37 = vpop.f32.mrf.mxu0  ;;  %v1858_v48 = vpack.c.bf16 %v669_v46, %v669_v46 }
  0xf2   : > { %v690_v39 = vpack.c.bf16 %v630_v36, %v630_v36  ;;  %v671_v49 = vpop.f32.mrf.mxu1 }
  0xf3   : > { %v632_v40 = vpop.f32.mrf.mxu0  ;;  %v759_v50 = vsel %vm757_vm2, %v1858_v48, 0 }
  0xf4   : > { %805 = vrot.lane.b32.xlu1 %v690_v39, %s1672_s22  ;;  %v697_v41 = vsel %vm692_vm1, %v690_v39, 0  ;;  %v1517_v51 = vpop.f32.mrf.mxu1 }
  0xf5   : > { %1519 = vmatpush3.bf16.xpose.msra.mxu1 %v697_v41 }
  0xf6   : > { %1524 = vmatprep.subr.bf16.mxu1 %v1670_v4 }
  0xf8   : > { %802 = vrot.lane.b32.xlu1 %v689_v42, %s1672_s22 }
  0xfc   : > { %916 = vrot.lane.b32.xlu1 %v689_v42, %s1673_s24  ;;  %1521 = vmatmul.mubr.msk.bf16.vlgmr.msra.gmra.mxu1 %vm692_vm1, %v689_v42 }
  0xfd   : > { %1526 = vmatprep.mubr.msk.bf16.mxu1 %vm1671_vm0, %v1670_v4  ;;  %1525 = vmatpush3.bf16.msra.mxu1 %v759_v50 }
  0xfe   : > { %1530 = vmatprep.subr.bf16.mxu1 %v1670_v4 }
 0x100   : > { %1030 = vrot.lane.b32.xlu1 %v690_v39, %s1674_s25 }
 0x104   : > { %1028 = vrot.lane.b32.xlu1 %v689_v42, %s1674_s25 }
 0x166   : > { %v806_v6 = vpop.permute.xlu1 %805 }
 0x167   : > { %v811_v17 = vsel %vm692_vm1, %v806_v6, 0 }
 0x16a   : > { %v803_v7 = vpop.permute.xlu1 %802 }
 0x16e   : > { %v917_v9 = vpop.permute.xlu1 %916 }
 0x172   : > { %v1031_v12 = vpop.permute.xlu1 %1030 }
 0x173   : > { %v1036_v13 = vsel %vm692_vm1, %v1031_v12, 0 }
 0x176   : > { %v1029_v18 = vpop.permute.xlu1 %1028 }
 0x1bc   : > { %v733_v56 = vpop.f32.mrf.mxu1 }
 0x1bd   : > { %v739_v58 = vmul.f32 0.17677669, %v733_v56 }
 0x1be   : > { %v1522_v59 = vpop.f32.mrf.mxu1 }
 0x1bf   : > { %v740_v60 = vadd.f32 %v739_v58, %v1869_v57 }
 0x1c0   : > { %v736_v61 = vpop.f32.mrf.mxu1 }
 0x1c1   : > { %v742_v62 = vsel %vm741_vm7, %v740_v60, -inf }
 0x1c2   : > { %743 = vmax.xlane.f32.xlu0 %v742_v62  ;;  %v1523_v63 = vpop.f32.mrf.mxu1 }
 0x24b   : > { %v744_v0 = vpop.xlane.xlu0 %743 }
 0x24c   : > { %v745_v1 = vsub.f32 %v740_v60, %v744_v0 }
 0x24e   : > { %v746_v2 = vmul.f32 1.442695, %v745_v1 }
 0x250   : > { %1641 = vpow2.f32 %v746_v2 }
 0x25d   : > { %v1642_v3 = vpop.eup %1641 }
 0x25e   : > { %v748_v5 = vsel %vm741_vm7, %v1642_v3, 0.0 }
 0x25f   : > { %749 = vadd.xlane.f32.xlu0 %v748_v5 }
 0x275   : > { %918 = vrot.lane.b32.xlu0 %v690_v39, %s1673_s24 }
 0x2e8   : > { %v750_v8 = vpop.xlane.xlu0 %749 }
 0x2e9   : > { %1643 = vrcp.f32 %v750_v8 }
 0x2ec   : > { %v919_v10 = vpop.permute.xlu0 %918 }
 0x2ed   : > { %v924_v11 = vsel %vm692_vm1, %v919_v10, 0 }
 0x2ee   : > { %1543 = vmatpush3.bf16.xpose.msra.mxu0 %v924_v11 }
 0x2ef   : > { %1554 = vmatprep.subr.bf16.mxu0 %v1670_v4 }
 0x2f5   : > { %1545 = vmatmul.mubr.msk.bf16.vlgmr.msra.gmra.mxu0 %vm692_vm1, %v917_v9 }
 0x2f6   : > { %v1644_v14 = vpop.eup %1643  ;;  %1555 = vmatpush3.bf16.xpose.msra.mxu0 %v1036_v13  ;;  %1556 = vmatprep.mubr.msk.bf16.mxu0 %vm1671_vm0, %v1670_v4 }
 0x2f7   : > { %v752_v15 = vmul.f32 %v1644_v14, %v1642_v3  ;;  %1566 = vmatprep.subr.bf16.mxu0 %v1670_v4 }
 0x2f9   : > { %v753_v16 = vpack.c.bf16 %v752_v15, %v752_v15  ;;  %v1633_v15 = vld [vmem:[%s1991_s5 + $0x38] sm:$0xff]  }
 0x2fb   : > { %1527 = vmatmul.mubr.msk.bf16.vlgmr.msra.gmra.mxu1 %vm741_vm7, %v753_v16  ;;  %v1634_v16 = vld [vmem:[%s1991_s5 + $0x30] sm:$0xff]  }
 0x2fc   : > { %1531 = vmatpush3.bf16.xpose.msra.mxu1 %v811_v17  ;;  %1532 = vmatprep.mubr.msk.bf16.mxu1 %vm1671_vm0, %v1670_v4  ;;  %v1635_v17 = vld [vmem:[%s1991_s5 + $0x28] sm:$0xff]  }
 0x2fd   : > { %1557 = vmatmul.mubr.msk.bf16.vlgmr.msra.gmra.mxu0 %vm692_vm1, %v1029_v18  ;;  %1536 = vmatprep.subr.bf16.mxu1 %v1670_v4  ;;  %v1636_v18 = vld [vmem:[%s1991_s5 + $0x20] sm:$0xff]  }
 0x2fe   : > { %1582 = vmatprep.mubr.msk.bf16.mxu0 %vm1671_vm0, %v1670_v4  ;;  %1567 = vmatpush3.bf16.msra.mxu0 %v1633_v15 }
 0x2ff   : > { %1568 = vmatprep.subr.bf16.mxu0 %v1670_v4 }
 0x302   : > { %1569 = vmatpush3.bf16.msra.mxu0 %v1634_v16 }
 0x303   : > { %1533 = vmatmul.mubr.msk.bf16.vlgmr.msra.gmra.mxu1 %vm692_vm1, %v803_v7  ;;  %1570 = vmatprep.subr.bf16.mxu0 %v1670_v4 }
 0x304   : > { %1538 = vmatprep.mubr.msk.bf16.mxu1 %vm1671_vm0, %v1670_v4 }
 0x306   : > { %1571 = vmatpush3.bf16.msra.mxu0 %v1635_v17 }
 0x307   : > { %1572 = vmatprep.subr.bf16.mxu0 %v1670_v4 }
 0x30a   : > { %1573 = vmatpush3.bf16.msra.mxu0 %v1636_v18 }
 0x30b   : > { %1574 = vmatprep.subr.bf16.mxu0 %v1670_v4 }
 0x3b5   : > { %v960_v19 = vpop.f32.mrf.mxu0 }
 0x3b6   : > { %v966_v20 = vmul.f32 0.17677669, %v960_v19  ;;  %v1637_v19 = vld [vmem:[%s1991_s5 + $0x18] sm:$0xff]  }
 0x3b7   : > { %v1546_v21 = vpop.f32.mrf.mxu0  ;;  %1575 = vmatpush3.bf16.msra.mxu0 %v1637_v19 }
 0x3b8   : > { %v967_v22 = vadd.f32 %v966_v20, %v1869_v57  ;;  %1576 = vmatprep.subr.bf16.mxu0 %v1670_v4  ;;  %v1638_v20 = vld [vmem:[%s1991_s5 + $0x10] sm:$0xff]   ;;  %v1639_v21 = vld [vmem:[%s1991_s5 + $0x8] sm:$0xff]  }
 0x3b9   : > { %v963_v23 = vpop.f32.mrf.mxu0 }
 0x3ba   : > { %v968_v25 = vsel %vm741_vm7, %v967_v22, -inf }
 0x3bb   : > { %969 = vmax.xlane.f32.xlu0 %v968_v25  ;;  %v1895_v26 = vpop.f32.mrf.mxu1  ;;  %v1547_v27 = vpop.f32.mrf.mxu0  ;;  %1577 = vmatpush3.bf16.msra.mxu0 %v1638_v20  ;;  %v1640_v25 = vld [vmem:[%s1991_s5] sm:$0xff]  }
 0x3bc   : > { %1578 = vmatprep.subr.bf16.mxu0 %v1670_v4 }
 0x3bd   : > { %v1528_v28 = vpop.f32.mrf.mxu1  ;;  %v1072_v29 = vpop.f32.mrf.mxu0 }
 0x3be   : > { %v1078_v36 = vmul.f32 0.17677669, %v1072_v29 }
 0x3bf   : > { %v798_v30 = vpop.f32.mrf.mxu1  ;;  %v1558_v31 = vpop.f32.mrf.mxu0  ;;  %1579 = vmatpush3.bf16.msra.mxu0 %v1639_v21 }
 0x3c0   : > { %v1079_v42 = vadd.f32 %v1078_v36, %v1869_v57  ;;  %1580 = vmatprep.subr.bf16.mxu0 %v1670_v4 }
 0x3c1   : > { %v1529_v32 = vpop.f32.mrf.mxu1  ;;  %v1075_v33 = vpop.f32.mrf.mxu0 }
 0x3c2   : > { %v1080_v44 = vsel %vm741_vm7, %v1079_v42, -inf }
 0x3c3   : > { %v847_v34 = vpop.f32.mrf.mxu1  ;;  %v1559_v35 = vpop.f32.mrf.mxu0  ;;  %1581 = vmatpush3.bf16.msra.mxu0 %v1640_v25 }
 0x3c4   : > { %v853_v37 = vmul.f32 0.17677669, %v847_v34 }
 0x3c5   : > { %v1534_v38 = vpop.f32.mrf.mxu1 }
 0x3c6   : > { %v854_v39 = vadd.f32 %v853_v37, %v1869_v57 }
 0x3c7   : > { %v850_v40 = vpop.f32.mrf.mxu1 }
 0x3c8   : > { %v855_v41 = vsel %vm741_vm7, %v854_v39, -inf }
 0x3c9   : > { %856 = vmax.xlane.f32.xlu1 %v855_v41  ;;  %v1535_v43 = vpop.f32.mrf.mxu1 }
 0x3ca   : > { %v1449_v43 = vld [vmem:[%s1992_s6] ss:$0 sm:$0xff] }
 0x3cd   : > { %1081 = vmax.xlane.f32.xlu1 %v1080_v44  ;;  %v415_v44 = vunpack.c.l.bf16 %v1824_v24  ;;  %v1458_v24 = vld [vmem:[%s1993_s7] ss:$0 sm:$0xff] }
 0x444   : > { %v970_v45 = vpop.xlane.xlu0 %969 }
 0x445   : > { %v971_v46 = vsub.f32 %v967_v22, %v970_v45 }
 0x447   : > { %v972_v47 = vmul.f32 1.442695, %v971_v46 }
 0x449   : > { %1645 = vpow2.f32 %v972_v47 }
 0x452   : > { %v857_v49 = vpop.xlane.xlu1 %856 }
 0x453   : > { %v858_v50 = vsub.f32 %v854_v39, %v857_v49 }
 0x455   : > { %v859_v55 = vmul.f32 1.442695, %v858_v50 }
 0x456   : > { %v1646_v51 = vpop.eup %1645  ;;  %v1082_v52 = vpop.xlane.xlu1 %1081 }
 0x457   : > { %v1083_v53 = vsub.f32 %v1079_v42, %v1082_v52  ;;  %v974_v54 = vsel %vm741_vm7, %v1646_v51, 0.0 }
 0x458   : > { %975 = vadd.xlane.f32.xlu0 %v974_v54 }
 0x459   : > { %v1084_v56 = vmul.f32 1.442695, %v1083_v53 }
 0x45b   : > { %1647 = vpow2.f32 %v1084_v56 }
 0x45c   : > { %1649 = vpow2.f32 %v859_v55 }
 0x468   : > { %v1648_v57 = vpop.eup %1647 }
 0x469   : > { %v1086_v58 = vsel %vm741_vm7, %v1648_v57, 0.0  ;;  %v1650_v59 = vpop.eup %1649 }
 0x46a   : > { %1087 = vadd.xlane.f32.xlu1 %v1086_v58  ;;  %v861_v60 = vsel %vm741_vm7, %v1650_v59, 0.0 }
 0x46e   : > { %868 = vrot.lane.b32.xlu0 %v1858_v48, %s1672_s22  ;;  %862 = vadd.xlane.f32.xlu1 %v861_v60  ;;  %v1459_v60 = vld [vmem:[%s1994_s8] ss:$0 sm:$0xff] }
 0x47f   : > { %980 = vrot.lane.b32.xlu1 %v1858_v48, %s1673_s24 }
 0x483   : > { %1092 = vrot.lane.b32.xlu1 %v1858_v48, %s1674_s25 }
 0x4e1   : > { %v976_v61 = vpop.xlane.xlu0 %975 }
 0x4e5   : > { %v869_v62 = vpop.permute.xlu0 %868 }
 0x4e6   : > { %v874_v63 = vsel %vm757_vm2, %v869_v62, 0 }
 0x4e7   : > { %1537 = vmatpush3.bf16.msra.mxu1 %v874_v63 }
 0x4e8   : > { %1548 = vmatprep.subr.bf16.mxu1 %v1670_v4 }
 0x4f3   : > { %v1088_v0 = vpop.xlane.xlu1 %1087 }
 0x4f7   : > { %v863_v1 = vpop.xlane.xlu1 %862 }
 0x4f8   : > { %1651 = vrcp.f32 %v863_v1 }
 0x4f9   : > { %1653 = vrcp.f32 %v976_v61 }
 0x4fa   : > { %1655 = vrcp.f32 %v1088_v0  ;;  %v1326_v0 = vld [vmem:[%s408_s21] sm:$0xff] }
 0x4fb   : > { %v981_v5 = vpop.permute.xlu1 %980 }
 0x4fc   : > { %v986_v8 = vsel %vm757_vm2, %v981_v5, 0 }
 0x4ff   : > { %v1093_v9 = vpop.permute.xlu1 %1092 }
 0x500   : > { %v1098_v12 = vsel %vm757_vm2, %v1093_v9, 0  ;;  %v1460_v9 = vld [vmem:[%s1995_s9] ss:$0 sm:$0xff] }
 0x505   : > { %v1652_v2 = vpop.eup %1651 }
 0x506   : > { %v865_v3 = vmul.f32 %v1652_v2, %v1650_v59  ;;  %v1654_v7 = vpop.eup %1653 }
 0x507   : > { %v978_v48 = vmul.f32 %v1654_v7, %v1646_v51  ;;  %v1656_v11 = vpop.eup %1655 }
 0x508   : > { %v866_v6 = vpack.c.bf16 %v865_v3, %v865_v3  ;;  %v1090_v13 = vmul.f32 %v1656_v11, %v1648_v57  ;;  %v1461_v11 = vld [vmem:[%s1996_s10] ss:$0 sm:$0xff] }
 0x509   : > { %v979_v10 = vpack.c.bf16 %v978_v48, %v978_v48 }
 0x50a   : > { %1539 = vmatmul.mubr.msk.bf16.vlgmr.msra.gmra.mxu1 %vm741_vm7, %v866_v6  ;;  %v1091_v14 = vpack.c.bf16 %v1090_v13, %v1090_v13 }
 0x50b   : > { %1549 = vmatpush3.bf16.msra.mxu1 %v986_v8  ;;  %1550 = vmatprep.mubr.msk.bf16.mxu1 %vm1671_vm0, %v1670_v4 }
 0x50c   : > { %1560 = vmatprep.subr.bf16.mxu1 %v1670_v4 }
 0x512   : > { %1551 = vmatmul.mubr.msk.bf16.vlgmr.msra.gmra.mxu1 %vm741_vm7, %v979_v10 }
 0x513   : > { %1561 = vmatpush3.bf16.msra.mxu1 %v1098_v12  ;;  %1562 = vmatprep.mubr.msk.bf16.mxu1 %vm1671_vm0, %v1670_v4 }
 0x51a   : > { %1563 = vmatmul.mubr.msk.bf16.vlgmr.msra.gmra.mxu1 %vm741_vm7, %v1091_v14 }
 0x5ca   : > { %v910_v22 = vpop.f32.mrf.mxu1 }
 0x5cb   : > { %1141 = vrot.lane.b32.xlu0 %v910_v22, %s1674_s25 }
 0x5cc   : > { %v1540_v23 = vpop.f32.mrf.mxu1 }
 0x5ce   : > { %v913_v27 = vpop.f32.mrf.mxu1 }
 0x5d0   : > { %v1541_v28 = vpop.f32.mrf.mxu1 }
 0x5d2   : > { %v1022_v29 = vpop.f32.mrf.mxu1 }
 0x5d3   : > { %1145 = vrot.lane.b32.xlu1 %v1022_v29, %s1673_s24  ;;  %s412_s24 = scalar_lea.vmem %s1997_s11, %s1414_s23 }
 0x5d4   : > { %v1552_v30 = vpop.f32.mrf.mxu1 }
 0x5d6   : > { %v1025_v31 = vpop.f32.mrf.mxu1 }
 0x5d8   : > { %v1553_v32 = vpop.f32.mrf.mxu1 }
 0x5da   : > { %v1134_v33 = vpop.f32.mrf.mxu1 }
 0x5db   : > { %1149 = vrot.lane.b32.xlu0 %v1134_v33, %s1672_s22 }
 0x5dc   : > { %v1564_v34 = vpop.f32.mrf.mxu1 }
 0x5de   : > { %v1137_v35 = vpop.f32.mrf.mxu1 }
 0x5e0   : > { %v1565_v36 = vpop.f32.mrf.mxu1 }
 0x63d   : > { %v1142_v4 = vpop.permute.xlu0 %1141 }
 0x63e   : > { %v1152_v38 = vsel %vm692_vm1, %v1895_v26, %v1142_v4 }
 0x645   : > { %v1146_v37 = vpop.permute.xlu1 %1145 }
 0x646   : > { %v1154_v39 = vsel %vm1153_vm8, %v1152_v38, %v1146_v37 }
 0x64d   : > { %v1150_v40 = vpop.permute.xlu0 %1149 }
 0x64e   : > { %v1156_v41 = vsel %vm1155_vm9, %v1154_v39, %v1150_v40 }
 0x64f   : > { %v1157_v42 = vpack.c.bf16 %v1156_v41, %v1156_v41 }
 0x651   : > { %1583 = vmatmul.mubr.bf16.vlgmr.msra.gmra.mxu0 %v1157_v42 }
 0x711   : > { %v1263_v45 = vpop.f32.mrf.mxu0 }
 0x712   : > { %v1264_v46 = vadd.f32 %v1449_v43, %v1263_v45 }
 0x713   : > { %v1584_v47 = vpop.f32.mrf.mxu0 }
 0x714   : > { %v1269_v49 = vadd.f32 %v1264_v46, %v415_v44 }
 0x715   : > { %v1266_v50 = vpop.f32.mrf.mxu0 }
 0x716   : > { %1272 = vadd.xlane.f32.xlu1 %v1269_v49 }
 0x717   : > { %v1585_v51 = vpop.f32.mrf.mxu0 }
 0x79f   : > { %v1273_v52 = vpop.xlane.xlu1 %1272 }
 0x7a0   : > { %v1275_v26 = vmul.f32 0.0078125, %v1273_v52 }
 0x7a2   : > { %v1276_v53 = vsub.f32 %v1269_v49, %v1275_v26 }
 0x7a4   : > { %v1277_v54 = vmul.f32 %v1276_v53, %v1276_v53 }
 0x7a6   : > { %1278 = vadd.xlane.f32.xlu0 %v1277_v54 }
 0x82f   : > { %v1279_v55 = vpop.xlane.xlu0 %1278 }
 0x830   : > { %v1280_v56 = vmul.f32 0.0078125, %v1279_v55 }
 0x832   : > { %v1281_v57 = vadd.f32 1e-05, %v1280_v56 }
 0x834   : > { %1657 = vrsqrt.f32 %v1281_v57 }
 0x841   : > { %v1658_v58 = vpop.eup %1657 }
 0x842   : > { %v1283_v59 = vmul.f32 %v1658_v58, %v1276_v53 }
 0x844   : > { %v1290_v61 = vmul.f32 %v1458_v24, %v1283_v59 }
 0x846   : > { %v1297_v62 = vadd.f32 %v1459_v60, %v1290_v61 }
 0x848   : > { %v1298_v63 = vadd.f32 %v1297_v62, %v415_v44 }
 0x84a   : > { %1301 = vadd.xlane.f32.xlu0 %v1298_v63 }
 0x860   : > { %1329 = vperm.xlu0 %1600, %v1326_v0  }
 0x8d3   : > { %v1302_v1 = vpop.xlane.xlu0 %1301 }
 0x8d4   : > { %v1303_v2 = vmul.f32 0.0078125, %v1302_v1 }
 0x8d6   : > { %v1304_v3 = vsub.f32 %v1298_v63, %v1303_v2 }
 0x8d8   : > { %v1305_v5 = vmul.f32 %v1304_v3, %v1304_v3 }
 0x8da   : > { %1306 = vadd.xlane.f32.xlu1 %v1305_v5 }
 0x8db   : > { %v1330_v13 = vpop.permute.xlu0 %1329 }
 0x963   : > { %v1307_v6 = vpop.xlane.xlu1 %1306 }
 0x964   : > { %v1308_v7 = vmul.f32 0.0078125, %v1307_v6 }
 0x966   : > { %v1309_v8 = vadd.f32 1e-05, %v1308_v7 }
 0x968   : > { %1659 = vrsqrt.f32 %v1309_v8 }
 0x975   : > { %v1660_v48 = vpop.eup %1659 }
 0x976   : > { %v1311_v10 = vmul.f32 %v1660_v48, %v1304_v3 }
 0x978   : > { %v1318_v12 = vmul.f32 %v1460_v9, %v1311_v10 }
 0x97a   : > { %v1325_v14 = vadd.f32 %v1461_v11, %v1318_v12 }
 0x97c   : > { %v1332_v15 = vmul.f32 %v1330_v13, %v1325_v14 }
 0x97e   : > { %v1333_v16 = vpack.c.bf16 %v1332_v15, %v1332_v15 }
 0x980   : > { %1334 = vst [vmem:[%s412_s24] sm:$0xf] %v1333_v16 }
 0x981 PF: > { %s21_s17 = sadd.s32 1, %s1667_s17  }
 0x982   : > { %p18_p4 = scmp.ge.s32.totalorder %s21_s17, 4  }
 0x984   :  { %20 = sbr.rel (!%p18_p4) target bundleno = 1 (0x1), region = 100 }

</bundles_post_ra>
